<compile_context>
chip_gen: v5e
topology: v5e:2x2
jax: 0.10.0
libtpu: 0.0.40
codegen_flags: <defaults>
</compile_context>

<pallas_src>
import jax
import jax.numpy as jnp
from jax.experimental import pallas as pl
from jax.experimental.pallas import tpu as pltpu

LANES = 128


def _round_up(x, m):
    return (x + m - 1) // m * m


# ----------------------------- Pallas kernel --------------------------------
def _make_unet_down_kernel(L, R, base, taps2):
    """Fused 3-stage conv+BN+ReLU kernel.

    Activation rasters are flattened row-major zero-padded spatial grids of
    shape (R, C_pad); output pixel (r, c) lives at raster row base + r*Wp + c.
    A 3x3 conv is a sum over 9 static row offsets of contiguous-slice matmuls;
    the 4x4/s2 conv is a single matmul over a pre-built im2col slab.
    """
    zlead = base                 # rows [0, base) are zero padding
    ztail = R - (base + L)       # rows [base+L, R) are zero padding

    def kernel(x_ref, mask_ref, w1_ref, b1_ref, w2_ref, b2_ref, w3_ref, b3_ref,
               o_ref, a1_ref, a2_ref):
        mask = mask_ref[...]                              # (L, CPO) bf16

        def conv3x3(src_ref, w_ref, b_ref):
            acc = jnp.dot(src_ref[pl.ds(base + taps2[0], L), :], w_ref[0],
                          preferred_element_type=jnp.float32)
            for t in range(1, 9):                         # unrolled: 9 matmuls
                acc += jnp.dot(src_ref[pl.ds(base + taps2[t], L), :], w_ref[t],
                               preferred_element_type=jnp.float32)
            # BN scale already folded into w; bias = beta - mean*scale
            return jnp.maximum(acc + b_ref[...], 0.0)

        # Zero only the border rows; the interior [base, base+L) is fully
        # overwritten (pad columns inside it are zeroed by the mask).
        cpad = a1_ref.shape[1]
        a1_ref[pl.ds(0, zlead), :] = jnp.zeros((zlead, cpad), a1_ref.dtype)
        a1_ref[pl.ds(base + L, ztail), :] = jnp.zeros((ztail, cpad), a1_ref.dtype)
        a2_ref[pl.ds(0, zlead), :] = jnp.zeros((zlead, cpad), a2_ref.dtype)
        a2_ref[pl.ds(base + L, ztail), :] = jnp.zeros((ztail, cpad), a2_ref.dtype)

        # stage 1: 4x4 stride-2 conv == single im2col matmul
        y1 = jnp.dot(x_ref[...], w1_ref[...], preferred_element_type=jnp.float32)
        y1 = jnp.maximum(y1 + b1_ref[...], 0.0)
        a1_ref[pl.ds(base, L), :] = y1.astype(a1_ref.dtype) * mask

        # stage 2: 3x3 stride-1 conv, intermediate stays in VMEM (bf16)
        y2 = conv3x3(a1_ref, w2_ref, b2_ref)
        a2_ref[pl.ds(base, L), :] = y2.astype(a2_ref.dtype) * mask

        # stage 3: no mask needed — the wrapper slices away pad columns/lanes
        o_ref[...] = conv3x3(a2_ref, w3_ref, b3_ref).astype(o_ref.dtype)

    return kernel


# ------------------------------- JAX glue ------------------------------------
def _fold_bn(w_oihw, gamma, beta, rmean, rvar, eps):
    scale = gamma / jnp.sqrt(rvar + eps)                  # (Cout,)
    bias = beta - rmean * scale                           # (Cout,)
    # (Cout,Cin,kh,kw) -> (kh,kw,Cin,Cout), BN scale folded into the weights
    w = jnp.transpose(w_oihw, (2, 3, 1, 0)) * scale
    return w, bias


def _pad_last(x, target):
    return jnp.pad(x, [(0, 0)] * (x.ndim - 1) + [(0, target - x.shape[-1])])


def unet_down(x_nchw, params, eps=1e-5):
    """UnetDown.forward (eval mode). NCHW in, NCHW out."""
    N, Cin, H, W = x_nchw.shape
    assert H % 2 == 0 and W % 2 == 0, "UnetDown expects even spatial dims"
    w1_, g1, be1, m1, v1 = params["dn_conv"]
    w2_, g2, be2, m2, v2 = params["conv1"]
    w3_, g3, be3, m3, v3 = params["conv2"]
    Cout = w1_.shape[0]

    Ho, Wo = H // 2, W // 2
    Wp = Wo + 2                            # raster width (>= Wo + 1 pad column)
    L = Ho * Wp                            # rows computed/stored per stage
    base = _round_up(Wp + 1, 16)           # 16-aligned => tile-aligned bf16 stores
    R = _round_up(base + L + Wp + 1, 16)   # raster rows incl. bottom halo
    K1 = _round_up(16 * Cin, LANES)        # stage-1 im2col K, lane-padded
    CPO = _round_up(Cout, LANES)           # output channels, lane-padded

    # ---- stage-1 input: NCHW -> NHWC, pad(1), 4x4/s2 im2col, bf16 ----
    x = jnp.transpose(x_nchw, (0, 2, 3, 1)).astype(jnp.float32)
    xp = jnp.pad(x, ((0, 0), (1, 1), (1, 1), (0, 0)))              # (N,H+2,W+2,Cin)
    cols = [xp[:, kh:kh + 2 * Ho:2, kw:kw + 2 * Wo:2, :]
            for kh in range(4) for kw in range(4)]                 # 16x (N,Ho,Wo,Cin)
    pat = jnp.concatenate(cols, axis=-1)                           # (N,Ho,Wo,16*Cin)
    pat = jnp.pad(pat, ((0, 0), (0, 0), (0, Wp - Wo), (0, K1 - 16 * Cin)))
    xs = pat.reshape(N, L, K1).astype(jnp.bfloat16)

    # ---- weights: fold BN, flatten taps, pad channels, cast to bf16 ----
    w1, b1 = _fold_bn(w1_, g1, be1, m1, v1, eps)                   # (4,4,Cin,Cout)
    w1 = w1.reshape(16 * Cin, Cout)                                # (kh,kw,ci) order
    w1 = _pad_last(jnp.pad(w1, ((0, K1 - 16 * Cin), (0, 0))), CPO)
    w2, b2 = _fold_bn(w2_, g2, be2, m2, v2, eps)                   # (3,3,Cout,Cout)
    w2 = _pad_last(jnp.pad(w2.reshape(9, Cout, Cout),
                           ((0, 0), (0, CPO - Cout), (0, 0))), CPO)
    w3, b3 = _fold_bn(w3_, g3, be3, m3, v3, eps)
    w3 = _pad_last(jnp.pad(w3.reshape(9, Cout, Cout),
                           ((0, 0), (0, CPO - Cout), (0, 0))), CPO)
    w1, w2, w3 = (w.astype(jnp.bfloat16) for w in (w1, w2, w3))
    b1, b2, b3 = (_pad_last(b.reshape(1, Cout), CPO).astype(jnp.float32)
                  for b in (b1, b2, b3))

    # mask of real output columns, pre-broadcast to full lane width (bf16)
    mask = (jnp.arange(L) % Wp < Wo).astype(jnp.bfloat16)[:, None]
    mask = jnp.broadcast_to(mask, (L, CPO))

    # static per-tap row offsets for the 3x3 stride-1 convs
    taps2 = tuple((kh - 1) * Wp + (kw - 1) for kh in range(3) for kw in range(3))

    out = pl.pallas_call(
        _make_unet_down_kernel(L, R, base, taps2),
        out_shape=jax.ShapeDtypeStruct((N, L, CPO), jnp.float32),
        grid=(N,),
        in_specs=[
            pl.BlockSpec((None, L, K1), lambda n: (n, 0, 0)),
            pl.BlockSpec((L, CPO), lambda n: (0, 0)),
            pl.BlockSpec((K1, CPO), lambda n: (0, 0)),
            pl.BlockSpec((1, CPO), lambda n: (0, 0)),
            pl.BlockSpec((9, CPO, CPO), lambda n: (0, 0, 0)),
            pl.BlockSpec((1, CPO), lambda n: (0, 0)),
            pl.BlockSpec((9, CPO, CPO), lambda n: (0, 0, 0)),
            pl.BlockSpec((1, CPO), lambda n: (0, 0)),
        ],
        out_specs=pl.BlockSpec((None, L, CPO), lambda n: (n, 0, 0)),
        scratch_shapes=[pltpu.VMEM((R, CPO), jnp.bfloat16),
                        pltpu.VMEM((R, CPO), jnp.bfloat16)],
        compiler_params=pltpu.CompilerParams(dimension_semantics=("parallel",)),
    )(xs, mask, w1, b1, w2, b2, w3, b3)

    # (N, Ho*Wp, CPO) -> (N, Ho, Wo, Cout) -> NCHW
    y = out.reshape(N, Ho, Wp, CPO)[:, :, :Wo, :Cout]
    return jnp.transpose(y, (0, 3, 1, 2))


# ----------------------------- parameter init --------------------------------
def init_params(key, in_channels, out_channels):
    def conv_bn(key, cin, cout, k):
        kw, kg, kb = jax.random.split(key, 3)
        w = 0.1 * jax.random.normal(kw, (cout, cin, k, k), jnp.float32)
        gamma = 1.0 + 0.05 * jax.random.normal(kg, (cout,), jnp.float32)
        beta = 0.05 * jax.random.normal(kb, (cout,), jnp.float32)
        rmean = jnp.zeros((cout,), jnp.float32)   # PyTorch BN default running stats
        rvar = jnp.ones((cout,), jnp.float32)
        return (w, gamma, beta, rmean, rvar)

    k0, k1, k2 = jax.random.split(key, 3)
    return {
        "dn_conv": conv_bn(k0, in_channels, out_channels, 4),
        "conv1": conv_bn(k1, out_channels, out_channels, 3),
        "conv2": conv_bn(k2, out_channels, out_channels, 3),
    }


# ----------------------------- pure-JAX reference ----------------------------
def _ref_block(x_nhwc, params, stride, pad, eps=1e-5):
    w_oihw, gamma, beta, rmean, rvar = params
    w_hwio = jnp.transpose(w_oihw, (2, 3, 1, 0))
    y = jax.lax.conv_general_dilated(
        x_nhwc, w_hwio, (stride, stride), [(pad, pad), (pad, pad)],
        dimension_numbers=("NHWC", "HWIO", "NHWC"))
    scale = gamma / jnp.sqrt(rvar + eps)
    return jnp.maximum(y * scale + (beta - rmean * scale), 0.0)


def unet_down_ref(x_nchw, all_params):
    x = jnp.transpose(x_nchw, (0, 2, 3, 1))
    x = _ref_block(x, all_params["dn_conv"], 2, 1)
    x = _ref_block(x, all_params["conv1"], 1, 1)
    x = _ref_block(x, all_params["conv2"], 1, 1)
    return jnp.transpose(x, (0, 3, 1, 2))


# ---------------------------------- main --------------------------------------
if __name__ == "__main__":
    key = jax.random.PRNGKey(0)
    kx, kp = jax.random.split(key)

    N, C_in, C_out, H, W = 2, 4, 8, 16, 16
    x = jax.random.normal(kx, (N, C_in, H, W), jnp.float32)     # NCHW like PyTorch
    params = init_params(kp, C_in, C_out)

    out = jax.jit(unet_down)(x, params)
    out = jax.block_until_ready(out)
    assert out.shape == (N, C_out, H // 2, W // 2), out.shape

    ref = jax.block_until_ready(unet_down_ref(x, params))
    # bf16 MXU matmuls / bf16 intermediates (f32 accumulate) vs f32 reference
    err = float(jnp.max(jnp.abs(out - ref)))
    assert jnp.allclose(out, ref, rtol=5e-2, atol=5e-2), err

    print("KERNEL_OK")
</pallas_src>

<mosaic_0001>
module attributes {stable_mosaic.version = 11 : i64} {
  func.func @kernel(%arg0: i32, %arg1: memref<1x80x128xbf16, #tpu.memory_space<vmem>>, %arg2: memref<80x128xbf16, #tpu.memory_space<vmem>>, %arg3: memref<128x128xbf16, #tpu.memory_space<vmem>>, %arg4: memref<1x128xf32, #tpu.memory_space<vmem>>, %arg5: memref<9x128x128xbf16, #tpu.memory_space<vmem>>, %arg6: memref<1x128xf32, #tpu.memory_space<vmem>>, %arg7: memref<9x128x128xbf16, #tpu.memory_space<vmem>>, %arg8: memref<1x128xf32, #tpu.memory_space<vmem>>, %arg9: memref<1x80x128xf32, #tpu.memory_space<vmem>>, %arg10: memref<112x128xbf16, #tpu.memory_space<vmem>>, %arg11: memref<112x128xbf16, #tpu.memory_space<vmem>>) attributes {dimension_semantics = [#tpu.dimension_semantics<parallel>], iteration_bounds = array<i64: 2>, scalar_prefetch = 0 : i64, scratch_operands = 2 : i64, tpu.core_type = #tpu.core_type<tc>, window_params = [{transform_indices = @transform_0, window_bounds = array<i64: 1, 80, 128>}, {pipeline_mode = #tpu.pipeline_mode<synchronous>, transform_indices = @transform_1, window_bounds = array<i64: 80, 128>}, {pipeline_mode = #tpu.pipeline_mode<synchronous>, transform_indices = @transform_2, window_bounds = array<i64: 128, 128>}, {pipeline_mode = #tpu.pipeline_mode<synchronous>, transform_indices = @transform_3, window_bounds = array<i64: 1, 128>}, {pipeline_mode = #tpu.pipeline_mode<synchronous>, transform_indices = @transform_4, window_bounds = array<i64: 9, 128, 128>}, {pipeline_mode = #tpu.pipeline_mode<synchronous>, transform_indices = @transform_5, window_bounds = array<i64: 1, 128>}, {pipeline_mode = #tpu.pipeline_mode<synchronous>, transform_indices = @transform_6, window_bounds = array<i64: 9, 128, 128>}, {pipeline_mode = #tpu.pipeline_mode<synchronous>, transform_indices = @transform_7, window_bounds = array<i64: 1, 128>}, {transform_indices = @transform_8, window_bounds = array<i64: 1, 80, 128>}]} {
    %c0 = arith.constant 0 : index
    %c0_0 = arith.constant 0 : index
    %0 = vector.load %arg2[%c0, %c0_0] : memref<80x128xbf16, #tpu.memory_space<vmem>>, vector<80x128xbf16>
    %cst = arith.constant 0.000000e+00 : bf16
    %1 = vector.broadcast %cst : bf16 to vector<16x128xbf16>
    %c0_1 = arith.constant 0 : index
    %c0_2 = arith.constant 0 : index
    %2 = vector.load %arg10[%c0_1, %c0_2] : memref<112x128xbf16, #tpu.memory_space<vmem>>, vector<16x128xbf16>
    tpu.vector_store %arg10[%c0_1, %c0_2], %1 {strides = array<i32>} : memref<112x128xbf16, #tpu.memory_space<vmem>>, vector<16x128xbf16>,
    %cst_3 = arith.constant 0.000000e+00 : bf16
    %3 = vector.broadcast %cst_3 : bf16 to vector<16x128xbf16>
    %c96 = arith.constant 96 : index
    %c0_4 = arith.constant 0 : index
    %4 = vector.load %arg10[%c96, %c0_4] : memref<112x128xbf16, #tpu.memory_space<vmem>>, vector<16x128xbf16>
    tpu.vector_store %arg10[%c96, %c0_4], %3 {strides = array<i32>} : memref<112x128xbf16, #tpu.memory_space<vmem>>, vector<16x128xbf16>,
    %cst_5 = arith.constant 0.000000e+00 : bf16
    %5 = vector.broadcast %cst_5 : bf16 to vector<16x128xbf16>
    %c0_6 = arith.constant 0 : index
    %c0_7 = arith.constant 0 : index
    %6 = vector.load %arg11[%c0_6, %c0_7] : memref<112x128xbf16, #tpu.memory_space<vmem>>, vector<16x128xbf16>
    tpu.vector_store %arg11[%c0_6, %c0_7], %5 {strides = array<i32>} : memref<112x128xbf16, #tpu.memory_space<vmem>>, vector<16x128xbf16>,
    %cst_8 = arith.constant 0.000000e+00 : bf16
    %7 = vector.broadcast %cst_8 : bf16 to vector<16x128xbf16>
    %c96_9 = arith.constant 96 : index
    %c0_10 = arith.constant 0 : index
    %8 = vector.load %arg11[%c96_9, %c0_10] : memref<112x128xbf16, #tpu.memory_space<vmem>>, vector<16x128xbf16>
    tpu.vector_store %arg11[%c96_9, %c0_10], %7 {strides = array<i32>} : memref<112x128xbf16, #tpu.memory_space<vmem>>, vector<16x128xbf16>,
    %c0_11 = arith.constant 0 : index
    %c0_12 = arith.constant 0 : index
    %c0_13 = arith.constant 0 : index
    %9 = vector.load %arg1[%c0_11, %c0_12, %c0_13] : memref<1x80x128xbf16, #tpu.memory_space<vmem>>, vector<1x80x128xbf16>
    %10 = vector.shape_cast %9 : vector<1x80x128xbf16> to vector<80x128xbf16>
    %c0_14 = arith.constant 0 : index
    %c0_15 = arith.constant 0 : index
    %11 = vector.load %arg3[%c0_14, %c0_15] : memref<128x128xbf16, #tpu.memory_space<vmem>>, vector<128x128xbf16>
    %cst_16 = arith.constant dense<0.000000e+00> : vector<80x128xf32>
    %12 = tpu.matmul %10, %11, %cst_16 {dimension_numbers = #tpu.dot_dimension_numbers<[1], [0], [0], [1], [0, 0, 1, 1], [], []>} : vector<80x128xbf16>, vector<128x128xbf16>, vector<80x128xf32> -> vector<80x128xf32>
    %c0_17 = arith.constant 0 : index
    %c0_18 = arith.constant 0 : index
    %13 = vector.load %arg4[%c0_17, %c0_18] : memref<1x128xf32, #tpu.memory_space<vmem>>, vector<1x128xf32>
    %14 = vector.broadcast %13 : vector<1x128xf32> to vector<80x128xf32>
    %15 = arith.addf %12, %14 : vector<80x128xf32>
    %cst_19 = arith.constant 0.000000e+00 : f32
    %16 = vector.broadcast %cst_19 : f32 to vector<80x128xf32>
    %17 = arith.maximumf %15, %16 : vector<80x128xf32>
    %18 = arith.truncf %17 : vector<80x128xf32> to vector<80x128xbf16>
    %19 = arith.mulf %18, %0 : vector<80x128xbf16>
    %c16 = arith.constant 16 : index
    %c0_20 = arith.constant 0 : index
    %20 = vector.load %arg10[%c16, %c0_20] : memref<112x128xbf16, #tpu.memory_space<vmem>>, vector<80x128xbf16>
    tpu.vector_store %arg10[%c16, %c0_20], %19 {strides = array<i32>} : memref<112x128xbf16, #tpu.memory_space<vmem>>, vector<80x128xbf16>,
    %c5 = arith.constant 5 : index
    %c0_21 = arith.constant 0 : index
    %21 = vector.load %arg10[%c5, %c0_21] : memref<112x128xbf16, #tpu.memory_space<vmem>>, vector<80x128xbf16>
    %c0_22 = arith.constant 0 : index
    %c0_23 = arith.constant 0 : index
    %c0_24 = arith.constant 0 : index
    %22 = vector.load %arg5[%c0_22, %c0_23, %c0_24] : memref<9x128x128xbf16, #tpu.memory_space<vmem>>, vector<1x128x128xbf16>
    %23 = vector.shape_cast %22 : vector<1x128x128xbf16> to vector<128x128xbf16>
    %cst_25 = arith.constant dense<0.000000e+00> : vector<80x128xf32>
    %24 = tpu.matmul %21, %23, %cst_25 {dimension_numbers = #tpu.dot_dimension_numbers<[1], [0], [0], [1], [0, 0, 1, 1], [], []>} : vector<80x128xbf16>, vector<128x128xbf16>, vector<80x128xf32> -> vector<80x128xf32>
    %c6 = arith.constant 6 : index
    %c0_26 = arith.constant 0 : index
    %25 = vector.load %arg10[%c6, %c0_26] : memref<112x128xbf16, #tpu.memory_space<vmem>>, vector<80x128xbf16>
    %c1 = arith.constant 1 : index
    %c0_27 = arith.constant 0 : index
    %c0_28 = arith.constant 0 : index
    %26 = vector.load %arg5[%c1, %c0_27, %c0_28] : memref<9x128x128xbf16, #tpu.memory_space<vmem>>, vector<1x128x128xbf16>
    %27 = vector.shape_cast %26 : vector<1x128x128xbf16> to vector<128x128xbf16>
    %cst_29 = arith.constant dense<0.000000e+00> : vector<80x128xf32>
    %28 = tpu.matmul %25, %27, %cst_29 {dimension_numbers = #tpu.dot_dimension_numbers<[1], [0], [0], [1], [0, 0, 1, 1], [], []>} : vector<80x128xbf16>, vector<128x128xbf16>, vector<80x128xf32> -> vector<80x128xf32>
    %29 = arith.addf %24, %28 : vector<80x128xf32>
    %c7 = arith.constant 7 : index
    %c0_30 = arith.constant 0 : index
    %30 = vector.load %arg10[%c7, %c0_30] : memref<112x128xbf16, #tpu.memory_space<vmem>>, vector<80x128xbf16>
    %c2 = arith.constant 2 : index
    %c0_31 = arith.constant 0 : index
    %c0_32 = arith.constant 0 : index
    %31 = vector.load %arg5[%c2, %c0_31, %c0_32] : memref<9x128x128xbf16, #tpu.memory_space<vmem>>, vector<1x128x128xbf16>
    %32 = vector.shape_cast %31 : vector<1x128x128xbf16> to vector<128x128xbf16>
    %cst_33 = arith.constant dense<0.000000e+00> : vector<80x128xf32>
    %33 = tpu.matmul %30, %32, %cst_33 {dimension_numbers = #tpu.dot_dimension_numbers<[1], [0], [0], [1], [0, 0, 1, 1], [], []>} : vector<80x128xbf16>, vector<128x128xbf16>, vector<80x128xf32> -> vector<80x128xf32>
    %34 = arith.addf %29, %33 : vector<80x128xf32>
    %c15 = arith.constant 15 : index
    %c0_34 = arith.constant 0 : index
    %35 = vector.load %arg10[%c15, %c0_34] : memref<112x128xbf16, #tpu.memory_space<vmem>>, vector<80x128xbf16>
    %c3 = arith.constant 3 : index
    %c0_35 = arith.constant 0 : index
    %c0_36 = arith.constant 0 : index
    %36 = vector.load %arg5[%c3, %c0_35, %c0_36] : memref<9x128x128xbf16, #tpu.memory_space<vmem>>, vector<1x128x128xbf16>
    %37 = vector.shape_cast %36 : vector<1x128x128xbf16> to vector<128x128xbf16>
    %cst_37 = arith.constant dense<0.000000e+00> : vector<80x128xf32>
    %38 = tpu.matmul %35, %37, %cst_37 {dimension_numbers = #tpu.dot_dimension_numbers<[1], [0], [0], [1], [0, 0, 1, 1], [], []>} : vector<80x128xbf16>, vector<128x128xbf16>, vector<80x128xf32> -> vector<80x128xf32>
    %39 = arith.addf %34, %38 : vector<80x128xf32>
    %c16_38 = arith.constant 16 : index
    %c0_39 = arith.constant 0 : index
    %40 = vector.load %arg10[%c16_38, %c0_39] : memref<112x128xbf16, #tpu.memory_space<vmem>>, vector<80x128xbf16>
    %c4 = arith.constant 4 : index
    %c0_40 = arith.constant 0 : index
    %c0_41 = arith.constant 0 : index
    %41 = vector.load %arg5[%c4, %c0_40, %c0_41] : memref<9x128x128xbf16, #tpu.memory_space<vmem>>, vector<1x128x128xbf16>
    %42 = vector.shape_cast %41 : vector<1x128x128xbf16> to vector<128x128xbf16>
    %cst_42 = arith.constant dense<0.000000e+00> : vector<80x128xf32>
    %43 = tpu.matmul %40, %42, %cst_42 {dimension_numbers = #tpu.dot_dimension_numbers<[1], [0], [0], [1], [0, 0, 1, 1], [], []>} : vector<80x128xbf16>, vector<128x128xbf16>, vector<80x128xf32> -> vector<80x128xf32>
    %44 = arith.addf %39, %43 : vector<80x128xf32>
    %c17 = arith.constant 17 : index
    %c0_43 = arith.constant 0 : index
    %45 = vector.load %arg10[%c17, %c0_43] : memref<112x128xbf16, #tpu.memory_space<vmem>>, vector<80x128xbf16>
    %c5_44 = arith.constant 5 : index
    %c0_45 = arith.constant 0 : index
    %c0_46 = arith.constant 0 : index
    %46 = vector.load %arg5[%c5_44, %c0_45, %c0_46] : memref<9x128x128xbf16, #tpu.memory_space<vmem>>, vector<1x128x128xbf16>
    %47 = vector.shape_cast %46 : vector<1x128x128xbf16> to vector<128x128xbf16>
    %cst_47 = arith.constant dense<0.000000e+00> : vector<80x128xf32>
    %48 = tpu.matmul %45, %47, %cst_47 {dimension_numbers = #tpu.dot_dimension_numbers<[1], [0], [0], [1], [0, 0, 1, 1], [], []>} : vector<80x128xbf16>, vector<128x128xbf16>, vector<80x128xf32> -> vector<80x128xf32>
    %49 = arith.addf %44, %48 : vector<80x128xf32>
    %c25 = arith.constant 25 : index
    %c0_48 = arith.constant 0 : index
    %50 = vector.load %arg10[%c25, %c0_48] : memref<112x128xbf16, #tpu.memory_space<vmem>>, vector<80x128xbf16>
    %c6_49 = arith.constant 6 : index
    %c0_50 = arith.constant 0 : index
    %c0_51 = arith.constant 0 : index
    %51 = vector.load %arg5[%c6_49, %c0_50, %c0_51] : memref<9x128x128xbf16, #tpu.memory_space<vmem>>, vector<1x128x128xbf16>
    %52 = vector.shape_cast %51 : vector<1x128x128xbf16> to vector<128x128xbf16>
    %cst_52 = arith.constant dense<0.000000e+00> : vector<80x128xf32>
    %53 = tpu.matmul %50, %52, %cst_52 {dimension_numbers = #tpu.dot_dimension_numbers<[1], [0], [0], [1], [0, 0, 1, 1], [], []>} : vector<80x128xbf16>, vector<128x128xbf16>, vector<80x128xf32> -> vector<80x128xf32>
    %54 = arith.addf %49, %53 : vector<80x128xf32>
    %c26 = arith.constant 26 : index
    %c0_53 = arith.constant 0 : index
    %55 = vector.load %arg10[%c26, %c0_53] : memref<112x128xbf16, #tpu.memory_space<vmem>>, vector<80x128xbf16>
    %c7_54 = arith.constant 7 : index
    %c0_55 = arith.constant 0 : index
    %c0_56 = arith.constant 0 : index
    %56 = vector.load %arg5[%c7_54, %c0_55, %c0_56] : memref<9x128x128xbf16, #tpu.memory_space<vmem>>, vector<1x128x128xbf16>
    %57 = vector.shape_cast %56 : vector<1x128x128xbf16> to vector<128x128xbf16>
    %cst_57 = arith.constant dense<0.000000e+00> : vector<80x128xf32>
    %58 = tpu.matmul %55, %57, %cst_57 {dimension_numbers = #tpu.dot_dimension_numbers<[1], [0], [0], [1], [0, 0, 1, 1], [], []>} : vector<80x128xbf16>, vector<128x128xbf16>, vector<80x128xf32> -> vector<80x128xf32>
    %59 = arith.addf %54, %58 : vector<80x128xf32>
    %c27 = arith.constant 27 : index
    %c0_58 = arith.constant 0 : index
    %60 = vector.load %arg10[%c27, %c0_58] : memref<112x128xbf16, #tpu.memory_space<vmem>>, vector<80x128xbf16>
    %c8 = arith.constant 8 : index
    %c0_59 = arith.constant 0 : index
    %c0_60 = arith.constant 0 : index
    %61 = vector.load %arg5[%c8, %c0_59, %c0_60] : memref<9x128x128xbf16, #tpu.memory_space<vmem>>, vector<1x128x128xbf16>
    %62 = vector.shape_cast %61 : vector<1x128x128xbf16> to vector<128x128xbf16>
    %cst_61 = arith.constant dense<0.000000e+00> : vector<80x128xf32>
    %63 = tpu.matmul %60, %62, %cst_61 {dimension_numbers = #tpu.dot_dimension_numbers<[1], [0], [0], [1], [0, 0, 1, 1], [], []>} : vector<80x128xbf16>, vector<128x128xbf16>, vector<80x128xf32> -> vector<80x128xf32>
    %64 = arith.addf %59, %63 : vector<80x128xf32>
    %c0_62 = arith.constant 0 : index
    %c0_63 = arith.constant 0 : index
    %65 = vector.load %arg6[%c0_62, %c0_63] : memref<1x128xf32, #tpu.memory_space<vmem>>, vector<1x128xf32>
    %66 = vector.broadcast %65 : vector<1x128xf32> to vector<80x128xf32>
    %67 = arith.addf %64, %66 : vector<80x128xf32>
    %cst_64 = arith.constant 0.000000e+00 : f32
    %68 = vector.broadcast %cst_64 : f32 to vector<80x128xf32>
    %69 = arith.maximumf %67, %68 : vector<80x128xf32>
    %70 = arith.truncf %69 : vector<80x128xf32> to vector<80x128xbf16>
    %71 = arith.mulf %70, %0 : vector<80x128xbf16>
    %c16_65 = arith.constant 16 : index
    %c0_66 = arith.constant 0 : index
    %72 = vector.load %arg11[%c16_65, %c0_66] : memref<112x128xbf16, #tpu.memory_space<vmem>>, vector<80x128xbf16>
    tpu.vector_store %arg11[%c16_65, %c0_66], %71 {strides = array<i32>} : memref<112x128xbf16, #tpu.memory_space<vmem>>, vector<80x128xbf16>,
    %c5_67 = arith.constant 5 : index
    %c0_68 = arith.constant 0 : index
    %73 = vector.load %arg11[%c5_67, %c0_68] : memref<112x128xbf16, #tpu.memory_space<vmem>>, vector<80x128xbf16>
    %c0_69 = arith.constant 0 : index
    %c0_70 = arith.constant 0 : index
    %c0_71 = arith.constant 0 : index
    %74 = vector.load %arg7[%c0_69, %c0_70, %c0_71] : memref<9x128x128xbf16, #tpu.memory_space<vmem>>, vector<1x128x128xbf16>
    %75 = vector.shape_cast %74 : vector<1x128x128xbf16> to vector<128x128xbf16>
    %cst_72 = arith.constant dense<0.000000e+00> : vector<80x128xf32>
    %76 = tpu.matmul %73, %75, %cst_72 {dimension_numbers = #tpu.dot_dimension_numbers<[1], [0], [0], [1], [0, 0, 1, 1], [], []>} : vector<80x128xbf16>, vector<128x128xbf16>, vector<80x128xf32> -> vector<80x128xf32>
    %c6_73 = arith.constant 6 : index
    %c0_74 = arith.constant 0 : index
    %77 = vector.load %arg11[%c6_73, %c0_74] : memref<112x128xbf16, #tpu.memory_space<vmem>>, vector<80x128xbf16>
    %c1_75 = arith.constant 1 : index
    %c0_76 = arith.constant 0 : index
    %c0_77 = arith.constant 0 : index
    %78 = vector.load %arg7[%c1_75, %c0_76, %c0_77] : memref<9x128x128xbf16, #tpu.memory_space<vmem>>, vector<1x128x128xbf16>
    %79 = vector.shape_cast %78 : vector<1x128x128xbf16> to vector<128x128xbf16>
    %cst_78 = arith.constant dense<0.000000e+00> : vector<80x128xf32>
    %80 = tpu.matmul %77, %79, %cst_78 {dimension_numbers = #tpu.dot_dimension_numbers<[1], [0], [0], [1], [0, 0, 1, 1], [], []>} : vector<80x128xbf16>, vector<128x128xbf16>, vector<80x128xf32> -> vector<80x128xf32>
    %81 = arith.addf %76, %80 : vector<80x128xf32>
    %c7_79 = arith.constant 7 : index
    %c0_80 = arith.constant 0 : index
    %82 = vector.load %arg11[%c7_79, %c0_80] : memref<112x128xbf16, #tpu.memory_space<vmem>>, vector<80x128xbf16>
    %c2_81 = arith.constant 2 : index
    %c0_82 = arith.constant 0 : index
    %c0_83 = arith.constant 0 : index
    %83 = vector.load %arg7[%c2_81, %c0_82, %c0_83] : memref<9x128x128xbf16, #tpu.memory_space<vmem>>, vector<1x128x128xbf16>
    %84 = vector.shape_cast %83 : vector<1x128x128xbf16> to vector<128x128xbf16>
    %cst_84 = arith.constant dense<0.000000e+00> : vector<80x128xf32>
    %85 = tpu.matmul %82, %84, %cst_84 {dimension_numbers = #tpu.dot_dimension_numbers<[1], [0], [0], [1], [0, 0, 1, 1], [], []>} : vector<80x128xbf16>, vector<128x128xbf16>, vector<80x128xf32> -> vector<80x128xf32>
    %86 = arith.addf %81, %85 : vector<80x128xf32>
    %c15_85 = arith.constant 15 : index
    %c0_86 = arith.constant 0 : index
    %87 = vector.load %arg11[%c15_85, %c0_86] : memref<112x128xbf16, #tpu.memory_space<vmem>>, vector<80x128xbf16>
    %c3_87 = arith.constant 3 : index
    %c0_88 = arith.constant 0 : index
    %c0_89 = arith.constant 0 : index
    %88 = vector.load %arg7[%c3_87, %c0_88, %c0_89] : memref<9x128x128xbf16, #tpu.memory_space<vmem>>, vector<1x128x128xbf16>
    %89 = vector.shape_cast %88 : vector<1x128x128xbf16> to vector<128x128xbf16>
    %cst_90 = arith.constant dense<0.000000e+00> : vector<80x128xf32>
    %90 = tpu.matmul %87, %89, %cst_90 {dimension_numbers = #tpu.dot_dimension_numbers<[1], [0], [0], [1], [0, 0, 1, 1], [], []>} : vector<80x128xbf16>, vector<128x128xbf16>, vector<80x128xf32> -> vector<80x128xf32>
    %91 = arith.addf %86, %90 : vector<80x128xf32>
    %c16_91 = arith.constant 16 : index
    %c0_92 = arith.constant 0 : index
    %92 = vector.load %arg11[%c16_91, %c0_92] : memref<112x128xbf16, #tpu.memory_space<vmem>>, vector<80x128xbf16>
    %c4_93 = arith.constant 4 : index
    %c0_94 = arith.constant 0 : index
    %c0_95 = arith.constant 0 : index
    %93 = vector.load %arg7[%c4_93, %c0_94, %c0_95] : memref<9x128x128xbf16, #tpu.memory_space<vmem>>, vector<1x128x128xbf16>
    %94 = vector.shape_cast %93 : vector<1x128x128xbf16> to vector<128x128xbf16>
    %cst_96 = arith.constant dense<0.000000e+00> : vector<80x128xf32>
    %95 = tpu.matmul %92, %94, %cst_96 {dimension_numbers = #tpu.dot_dimension_numbers<[1], [0], [0], [1], [0, 0, 1, 1], [], []>} : vector<80x128xbf16>, vector<128x128xbf16>, vector<80x128xf32> -> vector<80x128xf32>
    %96 = arith.addf %91, %95 : vector<80x128xf32>
    %c17_97 = arith.constant 17 : index
    %c0_98 = arith.constant 0 : index
    %97 = vector.load %arg11[%c17_97, %c0_98] : memref<112x128xbf16, #tpu.memory_space<vmem>>, vector<80x128xbf16>
    %c5_99 = arith.constant 5 : index
    %c0_100 = arith.constant 0 : index
    %c0_101 = arith.constant 0 : index
    %98 = vector.load %arg7[%c5_99, %c0_100, %c0_101] : memref<9x128x128xbf16, #tpu.memory_space<vmem>>, vector<1x128x128xbf16>
    %99 = vector.shape_cast %98 : vector<1x128x128xbf16> to vector<128x128xbf16>
    %cst_102 = arith.constant dense<0.000000e+00> : vector<80x128xf32>
    %100 = tpu.matmul %97, %99, %cst_102 {dimension_numbers = #tpu.dot_dimension_numbers<[1], [0], [0], [1], [0, 0, 1, 1], [], []>} : vector<80x128xbf16>, vector<128x128xbf16>, vector<80x128xf32> -> vector<80x128xf32>
    %101 = arith.addf %96, %100 : vector<80x128xf32>
    %c25_103 = arith.constant 25 : index
    %c0_104 = arith.constant 0 : index
    %102 = vector.load %arg11[%c25_103, %c0_104] : memref<112x128xbf16, #tpu.memory_space<vmem>>, vector<80x128xbf16>
    %c6_105 = arith.constant 6 : index
    %c0_106 = arith.constant 0 : index
    %c0_107 = arith.constant 0 : index
    %103 = vector.load %arg7[%c6_105, %c0_106, %c0_107] : memref<9x128x128xbf16, #tpu.memory_space<vmem>>, vector<1x128x128xbf16>
    %104 = vector.shape_cast %103 : vector<1x128x128xbf16> to vector<128x128xbf16>
    %cst_108 = arith.constant dense<0.000000e+00> : vector<80x128xf32>
    %105 = tpu.matmul %102, %104, %cst_108 {dimension_numbers = #tpu.dot_dimension_numbers<[1], [0], [0], [1], [0, 0, 1, 1], [], []>} : vector<80x128xbf16>, vector<128x128xbf16>, vector<80x128xf32> -> vector<80x128xf32>
    %106 = arith.addf %101, %105 : vector<80x128xf32>
    %c26_109 = arith.constant 26 : index
    %c0_110 = arith.constant 0 : index
    %107 = vector.load %arg11[%c26_109, %c0_110] : memref<112x128xbf16, #tpu.memory_space<vmem>>, vector<80x128xbf16>
    %c7_111 = arith.constant 7 : index
    %c0_112 = arith.constant 0 : index
    %c0_113 = arith.constant 0 : index
    %108 = vector.load %arg7[%c7_111, %c0_112, %c0_113] : memref<9x128x128xbf16, #tpu.memory_space<vmem>>, vector<1x128x128xbf16>
    %109 = vector.shape_cast %108 : vector<1x128x128xbf16> to vector<128x128xbf16>
    %cst_114 = arith.constant dense<0.000000e+00> : vector<80x128xf32>
    %110 = tpu.matmul %107, %109, %cst_114 {dimension_numbers = #tpu.dot_dimension_numbers<[1], [0], [0], [1], [0, 0, 1, 1], [], []>} : vector<80x128xbf16>, vector<128x128xbf16>, vector<80x128xf32> -> vector<80x128xf32>
    %111 = arith.addf %106, %110 : vector<80x128xf32>
    %c27_115 = arith.constant 27 : index
    %c0_116 = arith.constant 0 : index
    %112 = vector.load %arg11[%c27_115, %c0_116] : memref<112x128xbf16, #tpu.memory_space<vmem>>, vector<80x128xbf16>
    %c8_117 = arith.constant 8 : index
    %c0_118 = arith.constant 0 : index
    %c0_119 = arith.constant 0 : index
    %113 = vector.load %arg7[%c8_117, %c0_118, %c0_119] : memref<9x128x128xbf16, #tpu.memory_space<vmem>>, vector<1x128x128xbf16>
    %114 = vector.shape_cast %113 : vector<1x128x128xbf16> to vector<128x128xbf16>
    %cst_120 = arith.constant dense<0.000000e+00> : vector<80x128xf32>
    %115 = tpu.matmul %112, %114, %cst_120 {dimension_numbers = #tpu.dot_dimension_numbers<[1], [0], [0], [1], [0, 0, 1, 1], [], []>} : vector<80x128xbf16>, vector<128x128xbf16>, vector<80x128xf32> -> vector<80x128xf32>
    %116 = arith.addf %111, %115 : vector<80x128xf32>
    %c0_121 = arith.constant 0 : index
    %c0_122 = arith.constant 0 : index
    %117 = vector.load %arg8[%c0_121, %c0_122] : memref<1x128xf32, #tpu.memory_space<vmem>>, vector<1x128xf32>
    %118 = vector.broadcast %117 : vector<1x128xf32> to vector<80x128xf32>
    %119 = arith.addf %116, %118 : vector<80x128xf32>
    %cst_123 = arith.constant 0.000000e+00 : f32
    %120 = vector.broadcast %cst_123 : f32 to vector<80x128xf32>
    %121 = arith.maximumf %119, %120 : vector<80x128xf32>
    %c0_124 = arith.constant 0 : index
    %c0_125 = arith.constant 0 : index
    %c0_126 = arith.constant 0 : index
    %122 = vector.load %arg9[%c0_124, %c0_125, %c0_126] : memref<1x80x128xf32, #tpu.memory_space<vmem>>, vector<1x80x128xf32>
    %123 = vector.shape_cast %122 : vector<1x80x128xf32> to vector<80x128xf32>
    %124 = vector.shape_cast %121 : vector<80x128xf32> to vector<1x80x128xf32>
    tpu.vector_store %arg9[%c0_124, %c0_125, %c0_126], %124 {strides = array<i32>} : memref<1x80x128xf32, #tpu.memory_space<vmem>>, vector<1x80x128xf32>,
    return
  }
  func.func @transform_0(%arg0: i32) -> (i32, i32, i32) {
    %c0_i32 = arith.constant 0 : i32
    %c0_i32_0 = arith.constant 0 : i32
    %c0_i32_1 = arith.constant 0 : i32
    return %arg0, %c0_i32, %c0_i32_0 : i32, i32, i32
  }
  func.func @transform_1(%arg0: i32) -> (i32, i32) {
    %c0_i32 = arith.constant 0 : i32
    %c0_i32_0 = arith.constant 0 : i32
    %c0_i32_1 = arith.constant 0 : i32
    return %c0_i32, %c0_i32_0 : i32, i32
  }
  func.func @transform_2(%arg0: i32) -> (i32, i32) {
    %c0_i32 = arith.constant 0 : i32
    %c0_i32_0 = arith.constant 0 : i32
    %c0_i32_1 = arith.constant 0 : i32
    return %c0_i32, %c0_i32_0 : i32, i32
  }
  func.func @transform_3(%arg0: i32) -> (i32, i32) {
    %c0_i32 = arith.constant 0 : i32
    %c0_i32_0 = arith.constant 0 : i32
    %c0_i32_1 = arith.constant 0 : i32
    return %c0_i32, %c0_i32_0 : i32, i32
  }
  func.func @transform_4(%arg0: i32) -> (i32, i32, i32) {
    %c0_i32 = arith.constant 0 : i32
    %c0_i32_0 = arith.constant 0 : i32
    %c0_i32_1 = arith.constant 0 : i32
    %c0_i32_2 = arith.constant 0 : i32
    return %c0_i32, %c0_i32_0, %c0_i32_1 : i32, i32, i32
  }
  func.func @transform_5(%arg0: i32) -> (i32, i32) {
    %c0_i32 = arith.constant 0 : i32
    %c0_i32_0 = arith.constant 0 : i32
    %c0_i32_1 = arith.constant 0 : i32
    return %c0_i32, %c0_i32_0 : i32, i32
  }
  func.func @transform_6(%arg0: i32) -> (i32, i32, i32) {
    %c0_i32 = arith.constant 0 : i32
    %c0_i32_0 = arith.constant 0 : i32
    %c0_i32_1 = arith.constant 0 : i32
    %c0_i32_2 = arith.constant 0 : i32
    return %c0_i32, %c0_i32_0, %c0_i32_1 : i32, i32, i32
  }
  func.func @transform_7(%arg0: i32) -> (i32, i32) {
    %c0_i32 = arith.constant 0 : i32
    %c0_i32_0 = arith.constant 0 : i32
    %c0_i32_1 = arith.constant 0 : i32
    return %c0_i32, %c0_i32_0 : i32, i32
  }
  func.func @transform_8(%arg0: i32) -> (i32, i32, i32) {
    %c0_i32 = arith.constant 0 : i32
    %c0_i32_0 = arith.constant 0 : i32
    %c0_i32_1 = arith.constant 0 : i32
    return %arg0, %c0_i32, %c0_i32_0 : i32, i32, i32
  }
}

</mosaic_0001>

<bundles_post_ra>
// kernel: unet_down.1
= control target key start
LH: loop header
LB: loop body
LE: loop exit
PB: predicated region body
PF: predicated region fallthrough
CT: control target
= control target key end

     0   :  { %s5104_s27 = smov 0   ;;  %s6313_s0 = inlined_call_operand.vmem [shape: bf16[2,80,128], index: 0, kind: input, shape index: {}]   ;;  %s6314_s1 = inlined_call_operand.vmem [shape: bf16[80,128], index: 1, kind: input, shape index: {}]   ;;  %s6315_s2 = inlined_call_operand.vmem [shape: bf16[128,128], index: 2, kind: input, shape index: {}]   ;;  %s6316_s3 = inlined_call_operand.vmem [shape: f32[1,128], index: 3, kind: input, shape index: {}]   ;;  %s6317_s4 = inlined_call_operand.vmem [shape: bf16[9,128,128], index: 4, kind: input, shape index: {}]   ;;  %s6318_s5 = inlined_call_operand.vmem [shape: f32[1,128], index: 5, kind: input, shape index: {}]   ;;  %s6319_s6 = inlined_call_operand.vmem [shape: bf16[9,128,128], index: 6, kind: input, shape index: {}]   ;;  %s6320_s7 = inlined_call_operand.vmem [shape: f32[1,128], index: 7, kind: input, shape index: {}]   ;;  %s6321_s8 = inlined_call_operand.vmem [shape: f32[2,80,128], index: 8, kind: output, shape index: {}]  }
   0x1 LB: > { %s3634_s28 = sadd.s32 4294967295, %s5056_s27   ;;  %p3638_p0 = scmp.ge.s32.totalorder %s5056_s27, 1  ;;  %s5056_s27 = sphi %s5104_s27, %s18_s27  }
   0x2   : > { %p262_p1 = scmp.lt.s32.totalorder %s5056_s27, 3 }
   0x4   : > { %p263_p2 = pnand %p3638_p0, %p262_p1 }
   0x5   : > { %p296_p3 = scmp.lt.s32.totalorder (!%p263_p2), %s3634_s28, 1 }
   0x6   : > { %266 = sbr.rel (%p263_p2) target bundleno = 894 (0x37e), region = 52 }
   0xb   : > { %v4643_v0 = vld [vmem:[%s6315_s2 + $0x38] sm:$0xff]  ;;  %v4642_v1 = vld [vmem:[%s6315_s2 + $0x30] sm:$0xff]  ;;  %v4641_v2 = vld [vmem:[%s6315_s2 + $0x28] sm:$0xff]  ;;  %s6323_s28 = smov (!%p296_p3, %s3634_s28), 1  ;;  %v5058_v26 = vmov 0   ;;  %vm610_vm0 = vcmask 1044480  }
   0xc   : > { %433 = vmatpush.bf16.msra.mxu0 %v4643_v0  ;;  %4996 = vmatpush.bf16.msra.mxu3 %v4643_v0  ;;  %v4640_v3 = vld [vmem:[%s6315_s2 + $0x20] sm:$0xff]  ;;  %v4639_v4 = vld [vmem:[%s6315_s2 + $0x18] sm:$0xff]  ;;  %v4638_v5 = vld [vmem:[%s6315_s2 + $0x10] sm:$0xff]  ;;  %s5030_s21 = smul.u32 40, %s6323_s28  ;;  %317 = vst [vmem:[#allocation2] sm:$0xf] %v5058_v26 }
   0xd   : > { %v4637_v6 = vld [vmem:[%s6315_s2 + $0x8] sm:$0xff]  ;;  %v4636_v7 = vld [vmem:[%s6315_s2] sm:$0xff]  ;;  %v4663_v13 = vld [vmem:[%s6317_s4 + $0x78] sm:$0xff]  ;;  %318 = vst [vmem:[#allocation2 + $0x4] sm:$0xf] %v5058_v26  ;;  %vm1746_vm5 = vcmask 1046528  }
   0xe   : > { %s300_s26 = scalar_lea.vmem %s6313_s0, %s5030_s21  ;;  %675 = vmatpush.bf16.msra.mxu1 %v4663_v13  ;;  %v4662_v14 = vld [vmem:[%s6317_s4 + $0x70] sm:$0xff]  ;;  %v4655_v15 = vld [vmem:[%s6317_s4 + $0x38] sm:$0xff]  ;;  %v4661_v17 = vld [vmem:[%s6317_s4 + $0x68] sm:$0xff]  ;;  %319 = vst [vmem:[#allocation2 + $0x30] sm:$0xf] %v5058_v26  ;;  %s5031_s11 = smul.u32 80, %s6323_s28 }
   0xf   : > { %v4631_v8 = vld [vmem:[%s300_s26] sm:$0xff]  ;;  %v4633_v9 = vld [vmem:[%s300_s26 + $0x10] sm:$0xff]  ;;  %v4632_v10 = vld [vmem:[%s300_s26 + $0x8] sm:$0xff]  ;;  %819 = vmatpush.bf16.msra.mxu2 %v4655_v15  ;;  %320 = vst [vmem:[#allocation2 + $0x34] sm:$0xf] %v5058_v26 }
  0x10   : > { %434 = vmatpush.bf16.msra.mxu0 %v4642_v1  ;;  %4997 = vmatpush.bf16.msra.mxu3 %v4642_v1  ;;  %v4634_v11 = vld [vmem:[%s300_s26 + $0x18] sm:$0xff]  ;;  %v4635_v12 = vld [vmem:[%s300_s26 + $0x20] sm:$0xff]  ;;  %v4654_v18 = vld [vmem:[%s6317_s4 + $0x30] sm:$0xff]  ;;  %321 = vst [vmem:[#allocation3] sm:$0xf] %v5058_v26  ;;  %s6280_s14 = scalar_lea.vmem %s6321_s8, %s5031_s11 }
  0x11   : > { %v4671_v16 = vld [vmem:[%s6317_s4 + $0xb8] sm:$0xff]  ;;  %v4670_v19 = vld [vmem:[%s6317_s4 + $0xb0] sm:$0xff]  ;;  %v4660_v20 = vld [vmem:[%s6317_s4 + $0x60] sm:$0xff]  ;;  %322 = vst [vmem:[#allocation3 + $0x4] sm:$0xf] %v5058_v26 }
  0x12   : > { %676 = vmatpush.bf16.msra.mxu1 %v4662_v14  ;;  %v4653_v21 = vld [vmem:[%s6317_s4 + $0x28] sm:$0xff]  ;;  %v4659_v23 = vld [vmem:[%s6317_s4 + $0x58] sm:$0xff]  ;;  %v4652_v24 = vld [vmem:[%s6317_s4 + $0x20] sm:$0xff]  ;;  %323 = vst [vmem:[#allocation3 + $0x30] sm:$0xf] %v5058_v26 }
  0x13   : > { %820 = vmatpush.bf16.msra.mxu2 %v4654_v18  ;;  %v4669_v22 = vld [vmem:[%s6317_s4 + $0xa8] sm:$0xff]  ;;  %v4668_v25 = vld [vmem:[%s6317_s4 + $0xa0] sm:$0xff]  ;;  %v4658_v27 = vld [vmem:[%s6317_s4 + $0x50] sm:$0xff]  ;;  %324 = vst [vmem:[#allocation3 + $0x34] sm:$0xf] %v5058_v26 }
  0x14   : > { %435 = vmatpush.bf16.msra.mxu0 %v4641_v2  ;;  %4998 = vmatpush.bf16.msra.mxu3 %v4641_v2  ;;  %v4651_v28 = vld [vmem:[%s6317_s4 + $0x18] sm:$0xff]  ;;  %v4657_v31 = vld [vmem:[%s6317_s4 + $0x48] sm:$0xff]  ;;  %v4650_v32 = vld [vmem:[%s6317_s4 + $0x10] sm:$0xff]  ;;  %vm712_vm1 = vsmask.f32 5376 }
  0x15   : > { %v4667_v29 = vld [vmem:[%s6317_s4 + $0x98] sm:$0xff]  ;;  %v4666_v33 = vld [vmem:[%s6317_s4 + $0x90] sm:$0xff]  ;;  %v4656_v35 = vld [vmem:[%s6317_s4 + $0x40] sm:$0xff]  ;;  %vm874_vm2 = vsmask.f32 4352 }
  0x16   : > { %677 = vmatpush.bf16.msra.mxu1 %v4661_v17  ;;  %v4679_v30 = vld [vmem:[%s6317_s4 + $0xf8] sm:$0xff]  ;;  %v4678_v34 = vld [vmem:[%s6317_s4 + $0xf0] sm:$0xff]  ;;  %v4649_v36 = vld [vmem:[%s6317_s4 + $0x8] sm:$0xff]  ;;  %vm1876_vm3 = vsmask.f32 6400 }
  0x17   : > { %821 = vmatpush.bf16.msra.mxu2 %v4653_v21  ;;  %v4665_v37 = vld [vmem:[%s6317_s4 + $0x88] sm:$0xff]  ;;  %v5217_v38 = vld [vmem:[%s6316_s3] ss:$0 sm:$0xff]  ;;  %v4675_v46 = vld [vmem:[%s6317_s4 + $0xd8] sm:$0xff]  ;;  %vm1386_vm4 = vsmask.f32 7424 }
  0x18   : > { %436 = vmatpush.bf16.msra.mxu0 %v4640_v3  ;;  %4999 = vmatpush.bf16.msra.mxu3 %v4640_v3  ;;  %v4677_v39 = vld [vmem:[%s6317_s4 + $0xe8] sm:$0xff]  ;;  %v4648_v41 = vld [vmem:[%s6317_s4] sm:$0xff]  ;;  %v4674_v54 = vld [vmem:[%s6317_s4 + $0xd0] sm:$0xff] }
  0x19   : > { %v4664_v42 = vld [vmem:[%s6317_s4 + $0x80] sm:$0xff]  ;;  %v4687_v58 = vld [vmem:[%s6317_s4 + $0x138] sm:$0xff]  ;;  %v5252_v62 = vld [vmem:[%s6314_s1 + $0x10] sm:$0xff]  }
  0x1a   : > { %678 = vmatpush.bf16.msra.mxu1 %v4660_v20  ;;  %v4676_v43 = vld [vmem:[%s6317_s4 + $0xe0] sm:$0xff]  ;;  %v4673_v2 = vld [vmem:[%s6317_s4 + $0xc8] sm:$0xff]  ;;  %v4825_v21 = vunpack.c.h.bf16 %v5252_v62 }
  0x1b   : > { %822 = vmatpush.bf16.msra.mxu2 %v4652_v24  ;;  %v5239_v51 = vld [vmem:[%s6314_s1] sm:$0xff]  }
  0x1c   : > { %437 = vmatpush.bf16.msra.mxu0 %v4639_v4  ;;  %5000 = vmatpush.bf16.msra.mxu3 %v4639_v4  ;;  %v564_v55 = vld [vmem:[#allocation2] sm:$0x8]  ;;  %v538_v57 = vld [vmem:[#allocation2 + $0x4] sm:$0xf]  ;;  %v4816_v60 = vunpack.c.l.bf16 %v5239_v51  ;;  %v4817_v0 = vunpack.c.h.bf16 %v5239_v51 }
  0x1d   : > { %v537_v59 = vld [vmem:[#allocation2] sm:$0xc]  ;;  %v593_v4 = vunpack.c.l.b16 %v564_v55 }
  0x1e   : > { %679 = vmatpush.bf16.msra.mxu1 %v4659_v23  ;;  %v4672_v17 = vld [vmem:[%s6317_s4 + $0xc0] sm:$0xff] }
  0x1f   : > { %823 = vmatpush.bf16.msra.mxu2 %v4651_v28 }
  0x20   : > { %438 = vmatpush.bf16.msra.mxu0 %v4638_v5  ;;  %5001 = vmatpush.bf16.msra.mxu3 %v4638_v5  ;;  %v594_v5 = vunpack.c.l.b16 %v538_v57 }
  0x22   : > { %680 = vmatpush.bf16.msra.mxu1 %v4658_v27  ;;  %v604_v18 = vpack.c.b16 %v594_v5, %v593_v4 }
  0x23   : > { %824 = vmatpush.bf16.msra.mxu2 %v4650_v32 }
  0x24   : > { %439 = vmatpush.bf16.msra.mxu0 %v4637_v6  ;;  %5002 = vmatpush.bf16.msra.mxu3 %v4637_v6  ;;  %v710_v6 = vunpack.c.l.b16 %v537_v59 }
  0x26   : > { %681 = vmatpush.bf16.msra.mxu1 %v4657_v31  ;;  %v5282_v31 = vld [vmem:[%s6314_s1 + $0x8] sm:$0xff]  }
  0x27   : > { %825 = vmatpush.bf16.msra.mxu2 %v4649_v36 }
  0x28   : > { %440 = vmatpush.bf16.msra.mxu0 %v4636_v7  ;;  %5003 = vmatpush.bf16.msra.mxu3 %v4636_v7 }
  0x2a   : > { %682 = vmatpush.bf16.msra.mxu1 %v4656_v35 }
  0x2b   : > { %441 = vmatmul.bf16.vlgmr.msra.gmra.mxu0 %v4631_v8  ;;  %451 = vmatmul.bf16.vlgmr.msra.gmra.mxu3 %v4633_v9  ;;  %v4686_v9 = vld [vmem:[%s6317_s4 + $0x130] sm:$0xff] }
  0x2c   : > { %961 = vmatpush.bf16.msrb.mxu3 %v4671_v16  ;;  %1167 = vmatpush.bf16.msrb.mxu0 %v4679_v30 }
  0x2d   : > { %826 = vmatpush.bf16.msra.mxu2 %v4648_v41  ;;  %v4820_v41 = vunpack.c.l.bf16 %v5282_v31 }
  0x2e   : > { %1286 = vmatpush.bf16.msrb.mxu1 %v4687_v58 }
  0x30   : > { %962 = vmatpush.bf16.msrb.mxu3 %v4670_v19  ;;  %1168 = vmatpush.bf16.msrb.mxu0 %v4678_v34  ;;  %v711_v19 = vpack.c.b16 %v594_v5, %v710_v6  ;;  %v879_v34 = vshll.u32 %v604_v18, 16 }
  0x32   : > { %1287 = vmatpush.bf16.msrb.mxu1 %v4686_v9  ;;  %v714_v27 = vshrl.u32 %v711_v19, 16  ;;  %v717_v28 = vshll.u32 %v711_v19, 16 }
  0x34   : > { %963 = vmatpush.bf16.msrb.mxu3 %v4669_v22  ;;  %1169 = vmatpush.bf16.msrb.mxu0 %v4677_v39 }
  0x38   : > { %964 = vmatpush.bf16.msrb.mxu3 %v4668_v25  ;;  %1170 = vmatpush.bf16.msrb.mxu0 %v4676_v43  ;;  %v719_v43 = vrot.slane %v717_v28, 3 }
  0x3b   : > { %446 = vmatmul.bf16.gmra.mxu0 %v4632_v10  ;;  %456 = vmatmul.bf16.gmra.mxu3 %v4634_v11  ;;  %v4824_v11 = vunpack.c.l.bf16 %v5252_v62 }
  0x3c   : > { %965 = vmatpush.bf16.msrb.mxu3 %v4667_v29  ;;  %1171 = vmatpush.bf16.msrb.mxu0 %v4675_v46  ;;  %v876_v29 = vshrl.u32 %v604_v18, 16 }
  0x3e   : > { %v878_v46 = vrot.slane %v876_v29, 3  ;;  %v4683_v29 = vld [vmem:[%s6317_s4 + $0x118] sm:$0xff] }
  0x40   : > { %966 = vmatpush.bf16.msrb.mxu3 %v4666_v33  ;;  %1172 = vmatpush.bf16.msrb.mxu0 %v4674_v54 }
  0x44   : > { %967 = vmatpush.bf16.msrb.mxu3 %v4665_v37  ;;  %1173 = vmatpush.bf16.msrb.mxu0 %v4673_v2  ;;  %v5288_v37 = vld [vmem:[%s6314_s1 + $0x18] sm:$0xff]  }
  0x48   : > { %968 = vmatpush.bf16.msrb.mxu3 %v4664_v42  ;;  %1174 = vmatpush.bf16.msrb.mxu0 %v4672_v17  ;;  %v716_v42 = vrot.slane %v714_v27, 2 }
  0x4a   : > { %v720_v58 = vor.u32 %v719_v43, %v716_v42 }
  0x4b   : > { %461 = vmatmul.bf16.gmra.mxu3 %v4635_v12 }
  0xa8   : > { %v442_v40 = vpop.f32.mrf.mxu0 }
  0xa9   : > { %v443_v44 = vadd.f32 %v5217_v38, %v442_v40 }
  0xab   : > { %v467_v45 = vmax.f32 %v443_v44, 0.0 }
  0xad   : > { %v477_v49 = vpack.c.bf16 %v467_v45, %v467_v45 }
  0xae   : > { %v452_v47 = vpop.f32.mrf.mxu3 }
  0xaf   : > { %v453_v48 = vadd.f32 %v5217_v38, %v452_v47  ;;  %v487_v61 = vunpack.c.l.bf16 %v477_v49  ;;  %v881_v47 = vrot.slane %v879_v34, 4  ;;  %v4828_v49 = vunpack.c.l.bf16 %v5288_v37 }
  0xb0   : > { %v444_v50 = vpop.f32.mrf.mxu0 }
  0xb1   : > { %v471_v52 = vmax.f32 %v453_v48, 0.0  ;;  %v445_v53 = vadd.f32 %v5217_v38, %v444_v50  ;;  %v507_v10 = vmul.f32 %v4816_v60, %v487_v61  ;;  %v4685_v48 = vld [vmem:[%s6317_s4 + $0x128] sm:$0xff]  ;;  %v4821_v50 = vunpack.c.h.bf16 %v5282_v31 }
  0xb2   : > { %1288 = vmatpush.bf16.msrb.mxu1 %v4685_v48  ;;  %v882_v4 = vor.u32 %v881_v47, %v878_v46 }
  0xb3   : > { %v468_v56 = vmax.f32 %v445_v53, 0.0  ;;  %v481_v63 = vpack.c.bf16 %v471_v52, %v471_v52  ;;  %v611_v53 = vrot.slane %v604_v18, 3  ;;  %v4829_v18 = vunpack.c.h.bf16 %v5288_v37 }
  0xb5   : > { %v478_v1 = vpack.c.bf16 %v468_v56, %v468_v56  ;;  %v491_v13 = vunpack.c.l.bf16 %v481_v63  ;;  %v4684_v63 = vld [vmem:[%s6317_s4 + $0x120] sm:$0xff] }
  0xb6   : > { %v454_v3 = vpop.f32.mrf.mxu3  ;;  %1289 = vmatpush.bf16.msrb.mxu1 %v4684_v63 }
  0xb7   : > { %v488_v7 = vunpack.c.l.bf16 %v478_v1  ;;  %v455_v8 = vadd.f32 %v5217_v38, %v454_v3  ;;  %v511_v24 = vmul.f32 %v4824_v11, %v491_v13 }
  0xb8   : > { %v447_v12 = vpop.f32.mrf.mxu0 }
  0xb9   : > { %v508_v14 = vmul.f32 %v4817_v0, %v488_v7  ;;  %v472_v15 = vmax.f32 %v455_v8, 0.0  ;;  %v448_v16 = vadd.f32 %v5217_v38, %v447_v12 }
  0xba   : > { %1290 = vmatpush.bf16.msrb.mxu1 %v4683_v29  ;;  %v4699_v29 = vld [vmem:[%s6317_s4 + $0x170] sm:$0xff] }
  0xbb   : > { %v5271_v20 = vpack.c.bf16 %v508_v14, %v507_v10  ;;  %v482_v22 = vpack.c.bf16 %v472_v15, %v472_v15  ;;  %v469_v23 = vmax.f32 %v448_v16, 0.0  ;;  %v4950_v15 = vld [vmem:[#allocation2 + $0x4] sm:$0x8] }
  0xbd   : > { %4928 = vst [vmem:[#allocation2 + $0x8] sm:$0xff] %v5271_v20   ;;  %v492_v25 = vunpack.c.l.bf16 %v482_v22  ;;  %v479_v32 = vpack.c.bf16 %v469_v23, %v469_v23 }
  0xbe   : > { %v457_v26 = vpop.f32.mrf.mxu3 }
  0xbf   : > { %v512_v30 = vmul.f32 %v4825_v21, %v492_v25  ;;  %v458_v33 = vadd.f32 %v5217_v38, %v457_v26  ;;  %v489_v44 = vunpack.c.l.bf16 %v479_v32 }
  0xc0   : > { %v449_v35 = vpop.f32.mrf.mxu0 }
  0xc1   : > { %v4847_v36 = vpack.c.bf16 %v512_v30, %v511_v24  ;;  %v473_v39 = vmax.f32 %v458_v33, 0.0  ;;  %v450_v40 = vadd.f32 %v5217_v38, %v449_v35  ;;  %v509_v1 = vmul.f32 %v4820_v41, %v489_v44 }
  0xc3   : > { %4930 = vst [vmem:[#allocation2 + $0x18] sm:$0xff] %v4847_v36   ;;  %v470_v45 = vmax.f32 %v450_v40, 0.0  ;;  %v483_v54 = vpack.c.bf16 %v473_v39, %v473_v39  ;;  %v5330_v36 = vld [vmem:[%s6314_s1 + $0x20] sm:$0xff]  }
  0xc4   : > { %v5297_v52 = vld [vmem:[#allocation2 + $0x8] sm:$0xff]  ;;  %v4832_v44 = vunpack.c.l.bf16 %v5330_v36 }
  0xc5   : > { %v480_v55 = vpack.c.bf16 %v470_v45, %v470_v45  ;;  %v612_v57 = vrot.slane %v5297_v52, 3  ;;  %v722_v59 = vshrl.u32 %v5297_v52, 16  ;;  %v725_v61 = vshll.u32 %v5297_v52, 16  ;;  %v5013_v16 = vld [vmem:[#allocation2 + $0x4] sm:$0xf0]  }
  0xc6   : > { %v459_v56 = vpop.f32.mrf.mxu3  ;;  %v493_v9 = vunpack.c.l.bf16 %v483_v54  ;;  %v4951_v27 = vor.u32 %v5013_v16, %v4950_v15 }
  0xc7   : > { %v490_v2 = vunpack.c.l.bf16 %v480_v55  ;;  %v460_v3 = vadd.f32 %v5217_v38, %v459_v56  ;;  %v613_v5 = vsel %vm610_vm0, %v611_v53, %v612_v57  ;;  %v724_v6 = vrot.slane %v722_v59, 2 }
  0xc8   : > { %v727_v7 = vrot.slane %v725_v61, 3  ;;  %v883_v8 = vrot.slane %v722_v59, 3  ;;  %683 = vmatmul.bf16.vlgmr.msra.gmra.mxu1 %v613_v5  ;;  %v884_v13 = vrot.slane %v725_v61, 4  ;;  %v513_v24 = vmul.f32 %v4828_v49, %v493_v9 }
  0xc9   : > { %v510_v10 = vmul.f32 %v4821_v50, %v490_v2  ;;  %v474_v12 = vmax.f32 %v460_v3, 0.0  ;;  %v1062_v35 = vshrl.u32 %v4951_v27, 16  ;;  %v1065_v40 = vshll.u32 %v4951_v27, 16 }
  0xca   : > { %v728_v14 = vor.u32 %v727_v7, %v724_v6  ;;  %v885_v22 = vor.u32 %v884_v13, %v883_v8  ;;  %v4682_v6 = vld [vmem:[%s6317_s4 + $0x110] sm:$0xff]  ;;  %v4833_v7 = vunpack.c.h.bf16 %v5330_v36  ;;  %v5346_v13 = vld [vmem:[#allocation2 + $0x18] sm:$0xff] }
  0xcb   : > { %v5311_v17 = vpack.c.bf16 %v510_v10, %v509_v1  ;;  %v484_v19 = vpack.c.bf16 %v474_v12, %v474_v12  ;;  %v1064_v45 = vrot.slane %v1062_v35, 3  ;;  %v1067_v56 = vrot.slane %v1065_v40, 4  ;;  %1291 = vmatpush.bf16.msrb.mxu1 %v4682_v6  ;;  %v4720_v6 = vld [vmem:[%s6317_s4 + $0x1f8] sm:$0xff] }
  0xcc   : > { %v729_v23 = vsel %vm712_vm1, %v720_v58, %v728_v14  ;;  %v886_v26 = vsel %vm874_vm2, %v882_v4, %v885_v22  ;;  %v740_v27 = vshrl.u32 %v5346_v13, 16  ;;  %1811 = vmatpush.bf16.msra.mxu0 %v4720_v6  ;;  %v4717_v6 = vld [vmem:[%s6317_s4 + $0x1e0] sm:$0xff] }
  0xcd   : > { %4929 = vst [vmem:[#allocation2 + $0x10] sm:$0xff] %v5311_v17   ;;  %v494_v25 = vunpack.c.l.bf16 %v484_v19  ;;  %827 = vmatmul.bf16.vlgmr.msra.gmra.mxu2 %v729_v23  ;;  %969 = vmatmul.bf16.vlgmr.msrb.gmra.mxu3 %v886_v26  ;;  %v1068_v10 = vor.u32 %v1067_v56, %v1064_v45  ;;  %v4710_v45 = vld [vmem:[%s6317_s4 + $0x1a8] sm:$0xff] }
  0xce   : > { %v462_v28 = vpop.f32.mrf.mxu3  ;;  %v742_v40 = vrot.slane %v740_v27, 2 }
  0xcf   : > { %v514_v30 = vmul.f32 %v4829_v18, %v494_v25  ;;  %v463_v32 = vadd.f32 %v5217_v38, %v462_v28  ;;  %v4700_v25 = vld [vmem:[%s6317_s4 + $0x178] sm:$0xff]  ;;  %v743_v28 = vshll.u32 %v5346_v13, 16 }
  0xd0   : > { %1484 = vmatpush.bf16.msrb.mxu2 %v4700_v25 }
  0xd1   : > { %v5325_v33 = vpack.c.bf16 %v514_v30, %v513_v24  ;;  %v475_v34 = vmax.f32 %v463_v32, 0.0  ;;  %v4711_v30 = vld [vmem:[%s6317_s4 + $0x1b0] sm:$0xff] }
  0xd3   : > { %4931 = vst [vmem:[#allocation2 + $0x20] sm:$0xff] %v5325_v33   ;;  %v485_v39 = vpack.c.bf16 %v475_v34, %v475_v34 }
  0xd4   : > { %v5333_v42 = vld [vmem:[#allocation2 + $0x10] sm:$0xff]  ;;  %1485 = vmatpush.bf16.msrb.mxu2 %v4699_v29  ;;  %v4706_v29 = vld [vmem:[%s6317_s4 + $0x188] sm:$0xff] }
  0xd5   : > { %v5015_v43 = vld [vmem:[#allocation2 + $0xc] sm:$0xff]   ;;  %v614_v47 = vrot.slane %v5333_v42, 3  ;;  %v731_v48 = vshrl.u32 %v5333_v42, 16  ;;  %v734_v52 = vshll.u32 %v5333_v42, 16  ;;  %v495_v54 = vunpack.c.l.bf16 %v485_v39  ;;  %v5017_v24 = vld [vmem:[#allocation2 + $0x14] sm:$0xff]  }
  0xd6   : > { %v464_v46 = vpop.f32.mrf.mxu3  ;;  %v1070_v53 = vshrl.u32 %v5015_v43, 16  ;;  %v1073_v58 = vshll.u32 %v5015_v43, 16  ;;  %v1079_v34 = vshrl.u32 %v5017_v24, 16  ;;  %v1082_v35 = vshll.u32 %v5017_v24, 16  ;;  %v4698_v43 = vld [vmem:[%s6317_s4 + $0x168] sm:$0xff] }
  0xd7   : > { %v465_v55 = vadd.f32 %v5217_v38, %v464_v46  ;;  %v615_v59 = vsel %vm610_vm0, %v612_v57, %v614_v47  ;;  %v733_v61 = vrot.slane %v731_v48, 2  ;;  %v736_v63 = vrot.slane %v734_v52, 3 }
  0xd8   : > { %v887_v1 = vrot.slane %v731_v48, 3  ;;  %688 = vmatmul.bf16.gmra.mxu1 %v615_v59  ;;  %v888_v3 = vrot.slane %v734_v52, 4  ;;  %v1072_v4 = vrot.slane %v1070_v53, 3  ;;  %v1075_v5 = vrot.slane %v1073_v58, 4  ;;  %1486 = vmatpush.bf16.msrb.mxu2 %v4698_v43  ;;  %v4697_v59 = vld [vmem:[%s6317_s4 + $0x160] sm:$0xff] }
  0xd9   : > { %v476_v2 = vmax.f32 %v465_v55, 0.0  ;;  %v737_v8 = vor.u32 %v736_v63, %v733_v61  ;;  %v515_v15 = vmul.f32 %v4832_v44, %v495_v54  ;;  %v616_v39 = vrot.slane %v5346_v13, 3  ;;  %v4709_v61 = vld [vmem:[%s6317_s4 + $0x1a0] sm:$0xff] }
  0xda   : > { %v889_v9 = vor.u32 %v888_v3, %v887_v1  ;;  %v1076_v12 = vor.u32 %v1075_v5, %v1072_v4  ;;  %v745_v42 = vrot.slane %v743_v28, 3  ;;  %v891_v46 = vrot.slane %v740_v27, 3  ;;  %v5396_v63 = vld [vmem:[#allocation2 + $0x20] sm:$0xff]  ;;  %v4696_v4 = vld [vmem:[%s6317_s4 + $0x158] sm:$0xff] }
  0xdb   : > { %v486_v38 = vpack.c.bf16 %v476_v2, %v476_v2  ;;  %v738_v57 = vsel %vm712_vm1, %v728_v14, %v737_v8  ;;  %v4712_v14 = vld [vmem:[%s6317_s4 + $0x1b8] sm:$0xff]  ;;  %v892_v48 = vrot.slane %v743_v28, 4  ;;  %v1081_v52 = vrot.slane %v1079_v34, 3  ;;  %v4694_v28 = vld [vmem:[%s6317_s4 + $0x148] sm:$0xff] }
  0xdc   : > { %v890_v19 = vsel %vm874_vm2, %v885_v22, %v889_v9  ;;  %v1077_v23 = vsel %vm874_vm2, %v1068_v10, %v1076_v12  ;;  %v4681_v22 = vld [vmem:[%s6317_s4 + $0x108] sm:$0xff]  ;;  %1681 = vmatpush.bf16.msra.mxu3 %v4712_v14  ;;  %v1084_v53 = vrot.slane %v1082_v35, 4  ;;  %v617_v54 = vsel %vm610_vm0, %v614_v47, %v616_v39  ;;  %1487 = vmatpush.bf16.msrb.mxu2 %v4697_v59  ;;  %v5019_v3 = vld [vmem:[#allocation2 + $0x1c] sm:$0xff]   ;;  %v4695_v10 = vld [vmem:[%s6317_s4 + $0x150] sm:$0xff] }
  0xdd   : > { %v496_v16 = vunpack.c.l.bf16 %v486_v38  ;;  %832 = vmatmul.bf16.gmra.mxu2 %v738_v57  ;;  %974 = vmatmul.bf16.gmra.mxu3 %v890_v19  ;;  %v5384_v55 = vor.u32 %v745_v42, %v742_v40  ;;  %v5386_v56 = vor.u32 %v892_v48, %v891_v46  ;;  %v4708_v5 = vld [vmem:[%s6317_s4 + $0x198] sm:$0xff]  ;;  %v752_v38 = vshll.u32 %v5396_v63, 16  ;;  %v4718_v40 = vld [vmem:[%s6317_s4 + $0x1e8] sm:$0xff] }
  0xde   : > { %1175 = vmatmul.bf16.vlgmr.msrb.gmra.mxu0 %v1077_v23  ;;  %1292 = vmatpush.bf16.msrb.mxu1 %v4681_v22  ;;  %v5388_v58 = vor.u32 %v1084_v53, %v1081_v52  ;;  %v1088_v57 = vshrl.u32 %v5019_v3, 16  ;;  %v5427_v19 = vld [vmem:[#allocation2 + $0x14] sm:$0xff]  ;;  %v618_v23 = vrot.slane %v5396_v63, 3 }
  0xdf   : > { %v516_v26 = vmul.f32 %v4833_v7, %v496_v16  ;;  %v747_v47 = vsel %vm712_vm1, %v737_v8, %v5384_v55  ;;  %v894_v1 = vsel %vm874_vm2, %v889_v9, %v5386_v56  ;;  %v749_v8 = vshrl.u32 %v5396_v63, 16  ;;  %v4680_v9 = vld [vmem:[%s6317_s4 + $0x100] sm:$0xff]  ;;  %v4719_v16 = vld [vmem:[%s6317_s4 + $0x1f0] sm:$0xff] }
  0xe0   : > { %1682 = vmatpush.bf16.msra.mxu3 %v4711_v30  ;;  %v1086_v2 = vsel %vm874_vm2, %v1076_v12, %v5388_v58  ;;  %1488 = vmatpush.bf16.msrb.mxu2 %v4696_v4  ;;  %v4707_v12 = vld [vmem:[%s6317_s4 + $0x190] sm:$0xff]  ;;  %v754_v25 = vrot.slane %v752_v38, 3  ;;  %v896_v27 = vrot.slane %v752_v38, 4  ;;  %v1090_v34 = vrot.slane %v1088_v57, 3  ;;  %v4705_v4 = vld [vmem:[%s6317_s4 + $0x180] sm:$0xff] }
  0xe1   : > { %v5371_v32 = vpack.c.bf16 %v516_v26, %v515_v15  ;;  %v1091_v15 = vshll.u32 %v5019_v3, 16  ;;  %v751_v24 = vrot.slane %v749_v8, 2  ;;  %v5430_v26 = vld [vmem:[#allocation2 + $0x1c] sm:$0xff]  ;;  %v895_v22 = vrot.slane %v749_v8, 3  ;;  %1812 = vmatpush.bf16.msra.mxu0 %v4719_v16 }
  0xe2   : > { %1293 = vmatpush.bf16.msrb.mxu1 %v4680_v9  ;;  %v1596_v42 = vshrl.u32 %v5427_v19, 16  ;;  %v619_v48 = vsel %vm610_vm0, %v616_v39, %v618_v23  ;;  %v4728_v39 = vld [vmem:[%s6317_s4 + $0x238] sm:$0xff]  ;;  %v4693_v3 = vld [vmem:[%s6317_s4 + $0x140] sm:$0xff] }
  0xe3   : > { %4932 = vst [vmem:[#allocation2 + $0x28] sm:$0xff] %v5371_v32   ;;  %v1093_v35 = vrot.slane %v1091_v15, 4  ;;  %v5452_v52 = vor.u32 %v754_v25, %v751_v24  ;;  %v5455_v59 = vor.u32 %v896_v27, %v895_v22  ;;  %v4716_v27 = vld [vmem:[%s6317_s4 + $0x1d8] sm:$0xff] }
  0xe4   : > { %1683 = vmatpush.bf16.msra.mxu3 %v4710_v45  ;;  %1489 = vmatpush.bf16.msrb.mxu2 %v4695_v10  ;;  %v1592_v45 = vshll.u32 %v5427_v19, 16 }
  0xe5   : > { %1813 = vmatpush.bf16.msra.mxu0 %v4718_v40  ;;  %v756_v10 = vsel %vm712_vm1, %v5384_v55, %v5452_v52  ;;  %v898_v15 = vsel %vm874_vm2, %v5386_v56, %v5455_v59 }
  0xe6   : > { %v1886_v9 = vrot.slane %v1592_v45, 2  ;;  %1963 = vmatpush.bf16.msra.mxu1 %v4728_v39 }
  0xe8   : > { %693 = vmatmul.bf16.gmra.mxu1 %v617_v54  ;;  %1684 = vmatpush.bf16.msra.mxu3 %v4709_v61  ;;  %v1604_v54 = vshrl.u32 %v5430_v26, 16  ;;  %v1600_v61 = vshll.u32 %v5430_v26, 16 }
  0xe9   : > { %1490 = vmatpush.bf16.msrb.mxu2 %v4694_v28  ;;  %1814 = vmatpush.bf16.msra.mxu0 %v4717_v6  ;;  %v4727_v28 = vld [vmem:[%s6317_s4 + $0x230] sm:$0xff] }
  0xea   : > { %v547_v14 = vld [vmem:[#allocation2 + $0x28] sm:$0x7]  ;;  %v5445_v46 = vld [vmem:[#allocation2 + $0x2c] sm:$0xff]  ;;  %v1889_v57 = vrot.slane %v1604_v54, 1  ;;  %v1890_v16 = vrot.slane %v1600_v61, 2  ;;  %1964 = vmatpush.bf16.msra.mxu1 %v4727_v28 }
  0xeb   : > { %v5438_v30 = vld [vmem:[#allocation2 + $0x24] sm:$0xff]  ;;  %v603_v53 = vunpack.c.l.b16 %v547_v14  ;;  %v1616_v8 = vshll.u32 %v5445_v46, 16  ;;  %v1620_v38 = vshrl.u32 %v5445_v46, 16  ;;  %v4715_v6 = vld [vmem:[%s6317_s4 + $0x1d0] sm:$0xff] }
  0xec   : > { %1685 = vmatpush.bf16.msra.mxu3 %v4708_v5  ;;  %v853_v43 = vld [vmem:[#allocation2 + $0x28] sm:$0xf]  ;;  %v1885_v5 = vrot.slane %v1596_v42, 1  ;;  %v1528_v28 = vld [vmem:[#allocation2 + $0xc] sm:$0xff]  }
  0xed   : > { %837 = vmatmul.bf16.gmra.mxu2 %v747_v47  ;;  %979 = vmatmul.bf16.gmra.mxu3 %v894_v1  ;;  %v1608_v47 = vshll.u32 %v5438_v30, 16  ;;  %v1612_v1 = vshrl.u32 %v5438_v30, 16  ;;  %v872_v13 = vunpack.c.l.b16 %v853_v43  ;;  %v5020_v22 = vld [vmem:[#allocation2 + $0x24] sm:$0xff]  }
  0xee   : > { %1180 = vmatmul.bf16.gmra.mxu0 %v1086_v2  ;;  %v5460_v2 = vor.u32 %v1093_v35, %v1090_v34  ;;  %1491 = vmatpush.bf16.msrb.mxu2 %v4693_v3  ;;  %v5497_v56 = vor.u32 %v1886_v9, %v1885_v5  ;;  %v1898_v35 = vrot.slane %v1616_v8, 2  ;;  %v1100_v5 = vshll.u32 %v5020_v22, 16 }
  0xef   : > { %v1893_v24 = vrot.slane %v1612_v1, 1  ;;  %v1894_v55 = vrot.slane %v1608_v47, 2  ;;  %v873_v14 = vpack.c.b16 %v872_v13, %v872_v13  ;;  %1815 = vmatpush.bf16.msra.mxu0 %v4716_v27 }
  0xf0   : > { %1686 = vmatpush.bf16.msra.mxu3 %v4707_v12  ;;  %v609_v12 = vpack.c.b16 %v603_v53, %v603_v53  ;;  %v1095_v25 = vsel %vm874_vm2, %v5388_v58, %v5460_v2  ;;  %v1897_v58 = vrot.slane %v1620_v38, 1 }
  0xf1   : > { %v1895_v34 = vor.u32 %v1894_v55, %v1893_v24  ;;  %v900_v39 = vshrl.u32 %v873_v14, 16  ;;  %v903_v3 = vshll.u32 %v873_v14, 16  ;;  %v5044_v14 = vld [vmem:[#allocation2 + $0xc] sm:$0xf0] }
  0xf2   : > { %v758_v40 = vshrl.u32 %v609_v12, 16  ;;  %v761_v43 = vshll.u32 %v609_v12, 16  ;;  %v5516_v13 = vor.u32 %v1898_v35, %v1897_v58  ;;  %v4878_v58 = vunpack.c.h.b16 %v5371_v32  ;;  %v4713_v35 = vld [vmem:[%s6317_s4 + $0x1c0] sm:$0xff] }
  0xf3   : > { %v905_v24 = vrot.slane %v903_v3, 4  ;;  %1816 = vmatpush.bf16.msra.mxu0 %v4715_v6  ;;  %v4726_v3 = vld [vmem:[%s6317_s4 + $0x228] sm:$0xff]  ;;  %v1587_v6 = vshll.u32 %v1528_v28, 16 }
  0xf4   : > { %1687 = vmatpush.bf16.msra.mxu3 %v4706_v29  ;;  %v1891_v29 = vor.u32 %v1890_v16, %v1889_v57  ;;  %v5523_v9 = vsel %vm1876_vm3, %v1895_v34, %v5516_v13  ;;  %v760_v57 = vrot.slane %v758_v40, 2  ;;  %v902_v16 = vrot.slane %v900_v39, 3  ;;  %v4688_v39 = vld [vmem:[#allocation2 + $0x8] sm:$0xff]  ;;  %1965 = vmatpush.bf16.msra.mxu1 %v4726_v3 }
  0xf6   : > { %v5514_v53 = vsel %vm1876_vm3, %v1891_v29, %v1895_v34 }
  0xf8   : > { %698 = vmatmul.bf16.gmra.mxu1 %v619_v48  ;;  %1688 = vmatpush.bf16.msra.mxu3 %v4705_v4  ;;  %v5511_v48 = vsel %vm1876_vm3, %v5497_v56, %v1891_v29  ;;  %v1097_v4 = vshrl.u32 %v5020_v22, 16  ;;  %v4714_v22 = vld [vmem:[%s6317_s4 + $0x1c8] sm:$0xff] }
  0xf9   : > { %1817 = vmatpush.bf16.msra.mxu0 %v4714_v22 }
  0xfa   : > { %v1099_v55 = vrot.slane %v1097_v4, 3  ;;  %v4689_v4 = vld [vmem:[#allocation2 + $0x10] sm:$0xff] }
  0xfd   : > { %842 = vmatmul.bf16.gmra.mxu2 %v756_v10  ;;  %984 = vmatmul.bf16.gmra.mxu3 %v898_v15  ;;  %v620_v10 = vrot.slane %v609_v12, 3  ;;  %v763_v15 = vrot.slane %v761_v43, 3  ;;  %v906_v12 = vor.u32 %v905_v24, %v902_v16  ;;  %v1060_v43 = vpack.c.b16 %v4878_v58, %v4878_v58 }
  0xfe   : > { %1185 = vmatmul.bf16.gmra.mxu0 %v1095_v25  ;;  %v1102_v25 = vrot.slane %v1100_v5, 4  ;;  %v1589_v16 = vrot.slane %v1587_v6, 1  ;;  %v1594_v58 = vrot.slane %v1592_v45, 1  ;;  %v1399_v45 = vshrl.u32 %v4689_v4, 16 }
  0xff   : > { %v621_v27 = vsel %vm610_vm0, %v618_v23, %v620_v10  ;;  %v764_v29 = vor.u32 %v763_v15, %v760_v57  ;;  %v907_v63 = vsel %vm874_vm2, %v5455_v59, %v906_v12  ;;  %1818 = vmatpush.bf16.msra.mxu0 %v4713_v35  ;;  %v1106_v5 = vshrl.u32 %v1060_v43, 16 }
 0x100   : > { %v1103_v34 = vor.u32 %v1102_v25, %v1099_v55  ;;  %v1109_v59 = vshll.u32 %v1060_v43, 16  ;;  %v1390_v10 = vshll.u32 %v4688_v39, 16  ;;  %v1585_v55 = vshrl.u32 %v1528_v28, 16  ;;  %v4690_v28 = vld [vmem:[#allocation2 + $0x18] sm:$0xff] }
 0x101   : > { %v765_v40 = vsel %vm712_vm1, %v5452_v52, %v764_v29  ;;  %v4725_v52 = vld [vmem:[%s6317_s4 + $0x220] sm:$0xff]  ;;  %v1108_v57 = vrot.slane %v1106_v5, 3  ;;  %v1388_v25 = vshrl.u32 %v4688_v39, 16  ;;  %v1403_v43 = vshll.u32 %v4690_v28, 16 }
 0x102   : > { %v1104_v23 = vsel %vm874_vm2, %v5460_v2, %v1103_v34  ;;  %v1395_v2 = vshll.u32 %v4689_v4, 16  ;;  %1966 = vmatpush.bf16.msra.mxu1 %v4725_v52  ;;  %v1111_v15 = vrot.slane %v1109_v59, 4  ;;  %v1392_v24 = vrot.slane %v1390_v10, 1  ;;  %v4723_v59 = vld [vmem:[%s6317_s4 + $0x210] sm:$0xff]  ;;  %v4691_v10 = vld [vmem:[#allocation2 + $0x20] sm:$0xff] }
 0x103   : > { %v1590_v29 = vor.u32 %v1589_v16, %v1585_v55  ;;  %v1405_v52 = vrot.slane %v1403_v43, 1  ;;  %v1598_v6 = vor.u32 %v1596_v42, %v1594_v58  ;;  %v4935_v42 = vld [vmem:[#allocation2 + $0x18] sm:$0xff]   ;;  %v1750_v55 = vrot.slane %v5430_v26, 1  ;;  %v1538_v43 = vld [vmem:[#allocation2 + $0x34] sm:$0x1] }
 0x104   : > { %v1397_v22 = vrot.slane %v1395_v2, 1  ;;  %v1393_v12 = vor.u32 %v1392_v24, %v1388_v25  ;;  %v4722_v2 = vld [vmem:[%s6317_s4 + $0x208] sm:$0xff]  ;;  %v1610_v24 = vrot.slane %v1608_v47, 1  ;;  %v1415_v47 = vshrl.u32 %v4691_v10, 16 }
 0x106   : > { %v1398_v35 = vsel %vm1386_vm4, %v1393_v12, %v1397_v22  ;;  %v1401_v3 = vor.u32 %v1399_v45, %v1397_v22  ;;  %v4721_v12 = vld [vmem:[%s6317_s4 + $0x200] sm:$0xff] }
 0x108   : > { %703 = vmatmul.bf16.gmra.mxu1 %v621_v27  ;;  %v1112_v27 = vor.u32 %v1111_v15, %v1108_v57  ;;  %v1406_v4 = vsel %vm1386_vm4, %v1401_v3, %v1405_v52  ;;  %v1407_v57 = vshrl.u32 %v4690_v28, 16  ;;  %v1411_v15 = vshll.u32 %v4691_v10, 16 }
 0x109   : > { %v1752_v28 = vrot.slane %v5438_v30, 1 }
 0x10a   : > { %v1413_v16 = vrot.slane %v1411_v15, 1 }
 0x10c   : > { %v1417_v26 = vor.u32 %v1415_v47, %v1413_v16 }
 0x10d   : > { %847 = vmatmul.bf16.gmra.mxu2 %v765_v40  ;;  %989 = vmatmul.bf16.gmra.mxu3 %v907_v63  ;;  %v1113_v40 = vsel %vm874_vm2, %v1103_v34, %v1112_v27  ;;  %v1595_v63 = vsel %vm1386_vm4, %v1590_v29, %v1594_v58  ;;  %v1602_v34 = vrot.slane %v1600_v61, 1  ;;  %v4692_v58 = vld [vmem:[#allocation2 + $0x28] sm:$0xff] }
 0x10e   : > { %1190 = vmatmul.bf16.gmra.mxu0 %v1104_v23  ;;  %v5045_v23 = vld [vmem:[#allocation2 + $0xc] sm:$0xe] }
 0x10f   : > { %v5556_v39 = vor.u32 %v5045_v23, %v5044_v14  ;;  %v1748_v14 = vrot.slane %v5427_v19, 1  ;;  %v1409_v19 = vor.u32 %v1407_v57, %v1405_v52  ;;  %v1606_v25 = vor.u32 %v1604_v54, %v1602_v34  ;;  %v1340_v23 = vld [vmem:[#allocation2 + $0x30] sm:$0x1] }
 0x110   : > { %v1379_v3 = vunpack.c.l.b16 %v1340_v23 }
 0x111   : > { %v1747_v5 = vrot.slane %v5556_v39, 1  ;;  %v1414_v22 = vsel %vm1386_vm4, %v1409_v19, %v1413_v16  ;;  %v1611_v27 = vsel %vm1386_vm4, %v1606_v25, %v1610_v24  ;;  %v1751_v29 = vsel %vm1746_vm5, %v1748_v14, %v1750_v55 }
 0x113   : > { %v1749_v61 = vsel %vm1746_vm5, %v1747_v5, %v1748_v14  ;;  %v1577_v5 = vunpack.c.l.b16 %v1538_v43 }
 0x115   : > { %v1583_v30 = vpack.c.b16 %v1577_v5, %v1577_v5 }
 0x117   : > { %v1756_v43 = vrot.slane %v1583_v30, 1 }
 0x118   : > { %1294 = vmatmul.bf16.vlgmr.msrb.gmra.mxu1 %v5271_v20  ;;  %v4724_v20 = vld [vmem:[%s6317_s4 + $0x218] sm:$0xff] }
 0x119   : > { %1967 = vmatpush.bf16.msra.mxu1 %v4724_v20  ;;  %v1618_v20 = vrot.slane %v1616_v8, 1 }
 0x11b   : > { %v1622_v19 = vor.u32 %v1620_v38, %v1618_v20 }
 0x11d   : > { %1492 = vmatmul.bf16.vlgmr.msrb.gmra.mxu2 %v1398_v35  ;;  %1689 = vmatmul.bf16.vlgmr.msra.gmra.mxu3 %v1595_v63  ;;  %v1419_v35 = vshll.u32 %v4692_v58, 16  ;;  %v1614_v63 = vor.u32 %v1612_v1, %v1610_v24  ;;  %v1754_v24 = vrot.slane %v5445_v46, 1 }
 0x11e   : > { %1195 = vmatmul.bf16.gmra.mxu0 %v1113_v40  ;;  %1968 = vmatpush.bf16.msra.mxu1 %v4723_v59  ;;  %v1385_v59 = vpack.c.b16 %v1379_v3, %v1379_v3 }
 0x11f   : > { %v1421_v54 = vrot.slane %v1419_v35, 1  ;;  %v1619_v52 = vsel %vm1386_vm4, %v1614_v63, %v1618_v20 }
 0x121   : > { %v1422_v45 = vsel %vm1386_vm4, %v1417_v26, %v1421_v54 }
 0x122   : > { %1969 = vmatpush.bf16.msra.mxu1 %v4722_v2 }
 0x126   : > { %1970 = vmatpush.bf16.msra.mxu1 %v4721_v12 }
 0x128   : > { %1299 = vmatmul.bf16.gmra.mxu1 %v5311_v17  ;;  %v1603_v17 = vsel %vm1386_vm4, %v1598_v6, %v1602_v34  ;;  %v1753_v34 = vsel %vm1746_vm5, %v1750_v55, %v1752_v28 }
 0x12d   : > { %1497 = vmatmul.bf16.gmra.mxu2 %v1406_v4  ;;  %1694 = vmatmul.bf16.gmra.mxu3 %v1603_v17  ;;  %v1423_v4 = vshrl.u32 %v4692_v58, 16  ;;  %v1427_v17 = vshll.u32 %v1385_v59, 16  ;;  %v1755_v58 = vsel %vm1746_vm5, %v1752_v28, %v1754_v24 }
 0x12e   : > { %1819 = vmatmul.bf16.vlgmr.msra.gmra.mxu0 %v1749_v61  ;;  %v1624_v61 = vshll.u32 %v1583_v30, 16 }
 0x12f   : > { %v1425_v57 = vor.u32 %v1423_v4, %v1421_v54  ;;  %v1429_v15 = vrot.slane %v1427_v17, 1 }
 0x130   : > { %v1626_v16 = vrot.slane %v1624_v61, 1 }
 0x132   : > { %v1627_v12 = vsel %vm1386_vm4, %v1622_v19, %v1626_v16 }
 0x138   : > { %1304 = vmatmul.bf16.gmra.mxu1 %v4935_v42 }
 0x13d   : > { %1502 = vmatmul.bf16.gmra.mxu2 %v1414_v22  ;;  %1699 = vmatmul.bf16.gmra.mxu3 %v1611_v27  ;;  %v1430_v22 = vsel %vm1386_vm4, %v1425_v57, %v1429_v15  ;;  %v1878_v27 = vshrl.u32 %v5556_v39, 16 }
 0x13e   : > { %1824 = vmatmul.bf16.gmra.mxu0 %v1751_v29  ;;  %v1881_v29 = vshll.u32 %v5556_v39, 16 }
 0x13f   : > { %v1880_v47 = vrot.slane %v1878_v27, 1 }
 0x140   : > { %v1883_v46 = vrot.slane %v1881_v29, 2 }
 0x142   : > { %v1884_v63 = vor.u32 %v1883_v46, %v1880_v47 }
 0x144   : > { %v1888_v23 = vsel %vm1876_vm3, %v1884_v63, %v5497_v56 }
 0x145   : > { %v684_v40 = vpop.f32.mrf.mxu1 }
 0x148   : > { %1309 = vmatmul.bf16.gmra.mxu1 %v5325_v33 }
 0x14d   : > { %1507 = vmatmul.bf16.gmra.mxu2 %v1422_v45  ;;  %1704 = vmatmul.bf16.gmra.mxu3 %v1619_v52  ;;  %v5594_v33 = vpop.f32.mrf.mxu1  ;;  %v1757_v52 = vsel %vm1746_vm5, %v1754_v24, %v1756_v43 }
 0x14e   : > { %1829 = vmatmul.bf16.gmra.mxu0 %v1753_v34 }
 0x150   : > { %v828_v1 = vpop.f32.mrf.mxu2  ;;  %v970_v6 = vpop.f32.mrf.mxu3 }
 0x151   : > { %v829_v8 = vadd.f32 %v828_v1, %v684_v40 }
 0x153   : > { %v995_v14 = vadd.f32 %v970_v6, %v829_v8 }
 0x155   : > { %v689_v10 = vpop.f32.mrf.mxu1 }
 0x158   : > { %v5596_v2 = vpop.f32.mrf.mxu2  ;;  %v5598_v42 = vpop.f32.mrf.mxu3  ;;  %1314 = vmatmul.bf16.gmra.mxu1 %v5371_v32 }
 0x15b   : > { %v1176_v55 = vpop.f32.mrf.mxu0 }
 0x15c   : > { %v1201_v25 = vadd.f32 %v1176_v55, %v995_v14 }
 0x15d   : > { %1512 = vmatmul.bf16.gmra.mxu2 %v1430_v22  ;;  %1709 = vmatmul.bf16.gmra.mxu3 %v1627_v12  ;;  %v5609_v32 = vpop.f32.mrf.mxu1 }
 0x15e   : > { %1834 = vmatmul.bf16.gmra.mxu0 %v1755_v58 }
 0x160   : > { %v833_v38 = vpop.f32.mrf.mxu2  ;;  %v975_v40 = vpop.f32.mrf.mxu3 }
 0x161   : > { %v834_v35 = vadd.f32 %v833_v38, %v689_v10  ;;  %v1855_v38 = vld [vmem:[#allocation2 + $0x34] sm:$0x3] }
 0x163   : > { %v997_v26 = vadd.f32 %v975_v40, %v834_v35  ;;  %v5611_v54 = vpop.f32.mrf.mxu0  ;;  %v1874_v40 = vunpack.c.l.b16 %v1855_v38 }
 0x165   : > { %v694_v20 = vpop.f32.mrf.mxu1 }
 0x168   : > { %v5613_v39 = vpop.f32.mrf.mxu2  ;;  %v5617_v28 = vpop.f32.mrf.mxu3  ;;  %1971 = vmatmul.bf16.vlgmr.msra.gmra.mxu1 %v1888_v23 }
 0x16b   : > { %v1181_v45 = vpop.f32.mrf.mxu0 }
 0x16c   : > { %v1203_v3 = vadd.f32 %v1181_v45, %v997_v26 }
 0x16d   : > { %v5620_v34 = vpop.f32.mrf.mxu1 }
 0x16e   : > { %1839 = vmatmul.bf16.gmra.mxu0 %v1757_v52  ;;  %v4748_v52 = vld [vmem:[%s6319_s6 + $0x78] sm:$0xff] }
 0x16f   : > { %2218 = vmatpush.bf16.msra.mxu2 %v4748_v52 }
 0x170   : > { %v838_v5 = vpop.f32.mrf.mxu2  ;;  %v980_v59 = vpop.f32.mrf.mxu3 }
 0x171   : > { %v839_v1 = vadd.f32 %v838_v5, %v694_v20  ;;  %v1875_v20 = vpack.c.b16 %v1874_v40, %v1874_v40 }
 0x173   : > { %v999_v8 = vadd.f32 %v980_v59, %v839_v1  ;;  %v5622_v6 = vpop.f32.mrf.mxu0  ;;  %v1905_v45 = vshll.u32 %v1875_v20, 16 }
 0x175   : > { %v699_v14 = vpop.f32.mrf.mxu1  ;;  %v1907_v59 = vrot.slane %v1905_v45, 2 }
 0x178   : > { %v5624_v4 = vpop.f32.mrf.mxu2  ;;  %v5626_v56 = vpop.f32.mrf.mxu3  ;;  %1976 = vmatmul.bf16.gmra.mxu1 %v5511_v48 }
 0x17b   : > { %v1186_v30 = vpop.f32.mrf.mxu0 }
 0x17c   : > { %v1205_v17 = vadd.f32 %v1186_v30, %v999_v8 }
 0x17d   : > { %v5629_v61 = vpop.f32.mrf.mxu1 }
 0x180   : > { %v843_v10 = vpop.f32.mrf.mxu2  ;;  %v985_v15 = vpop.f32.mrf.mxu3 }
 0x181   : > { %v844_v57 = vadd.f32 %v843_v10, %v699_v14 }
 0x183   : > { %v1001_v19 = vadd.f32 %v985_v15, %v844_v57  ;;  %v5631_v16 = vpop.f32.mrf.mxu0  ;;  %v4746_v57 = vld [vmem:[%s6319_s6 + $0x68] sm:$0xff] }
 0x185   : > { %v704_v24 = vpop.f32.mrf.mxu1 }
 0x188   : > { %v5633_v55 = vpop.f32.mrf.mxu2  ;;  %v5635_v22 = vpop.f32.mrf.mxu3  ;;  %1981 = vmatmul.bf16.gmra.mxu1 %v5514_v53  ;;  %v1902_v53 = vshrl.u32 %v1875_v20, 16 }
 0x18a   : > { %v1904_v1 = vrot.slane %v1902_v53, 1 }
 0x18b   : > { %v1191_v27 = vpop.f32.mrf.mxu0 }
 0x18c   : > { %v1207_v29 = vadd.f32 %v1191_v27, %v1001_v19  ;;  %v1908_v8 = vor.u32 %v1907_v59, %v1904_v1  ;;  %v831_v59 = vadd.f32 %v5596_v2, %v5594_v33  ;;  %v4739_v33 = vld [vmem:[%s6319_s6 + $0x30] sm:$0xff] }
 0x18d   : > { %v5638_v48 = vpop.f32.mrf.mxu1  ;;  %v4755_v2 = vld [vmem:[%s6319_s6 + $0xb0] sm:$0xff] }
 0x190   : > { %v848_v12 = vpop.f32.mrf.mxu2  ;;  %v990_v47 = vpop.f32.mrf.mxu3 }
 0x191   : > { %v849_v58 = vadd.f32 %v848_v12, %v704_v24  ;;  %v4745_v24 = vld [vmem:[%s6319_s6 + $0x60] sm:$0xff] }
 0x193   : > { %v1003_v46 = vadd.f32 %v990_v47, %v849_v58  ;;  %v5640_v35 = vpop.f32.mrf.mxu0  ;;  %v4744_v58 = vld [vmem:[%s6319_s6 + $0x58] sm:$0xff] }
 0x195   : > { %v1295_v26 = vpop.f32.mrf.mxu1 }
 0x196   : > { %v1320_v63 = vadd.f32 %v1295_v26, %v1201_v25  ;;  %v1909_v25 = vsel %vm1876_vm3, %v5516_v13, %v1908_v8 }
 0x198   : > { %1986 = vmatmul.bf16.gmra.mxu1 %v5523_v9  ;;  %v4747_v9 = vld [vmem:[%s6319_s6 + $0x70] sm:$0xff]  ;;  %v5667_v13 = vpop.f32.mrf.mxu3 }
 0x199   : > { %2219 = vmatpush.bf16.msra.mxu2 %v4747_v9  ;;  %v4756_v9 = vld [vmem:[%s6319_s6 + $0xb8] sm:$0xff] }
 0x19a   : > { %2502 = vmatpush.bf16.msrb.mxu0 %v4756_v9 }
 0x19b   : > { %v1196_v23 = vpop.f32.mrf.mxu0 }
 0x19c   : > { %v1209_v43 = vadd.f32 %v1196_v23, %v1003_v46 }
 0x19d   : > { %v1297_v5 = vpop.f32.mrf.mxu1  ;;  %2220 = vmatpush.bf16.msra.mxu2 %v4746_v57  ;;  %v996_v57 = vadd.f32 %v5598_v42, %v831_v59  ;;  %v4754_v42 = vld [vmem:[%s6319_s6 + $0xa8] sm:$0xff] }
 0x19e   : > { %2503 = vmatpush.bf16.msrb.mxu0 %v4755_v2 }
 0x1a0   : > { %v1690_v46 = vpop.f32.mrf.mxu3 }
 0x1a1   : > { %2221 = vmatpush.bf16.msra.mxu2 %v4745_v24  ;;  %v4742_v24 = vld [vmem:[%s6319_s6 + $0x48] sm:$0xff] }
 0x1a2   : > { %2504 = vmatpush.bf16.msrb.mxu0 %v4754_v42 }
 0x1a3   : > { %v5672_v38 = vpop.f32.mrf.mxu0 }
 0x1a5   : > { %v1300_v14 = vpop.f32.mrf.mxu1  ;;  %2222 = vmatpush.bf16.msra.mxu2 %v4744_v58  ;;  %v4738_v58 = vld [vmem:[%s6319_s6 + $0x28] sm:$0xff] }
 0x1a6   : > { %v5646_v30 = vadd.f32 %v1300_v14, %v1203_v3  ;;  %v5660_v3 = vpop.f32.mrf.mxu2  ;;  %v4740_v14 = vld [vmem:[%s6319_s6 + $0x38] sm:$0xff] }
 0x1a7   : > { %2361 = vmatpush.bf16.msrb.mxu3 %v4740_v14 }
 0x1a8   : > { %1991 = vmatmul.bf16.gmra.mxu1 %v1909_v25  ;;  %v1692_v23 = vpop.f32.mrf.mxu3 }
 0x1ab   : > { %v1820_v20 = vpop.f32.mrf.mxu0  ;;  %2362 = vmatpush.bf16.msrb.mxu3 %v4739_v33 }
 0x1ad   : > { %v5653_v10 = vpop.f32.mrf.mxu1 }
 0x1ae   : > { %v1493_v12 = vpop.f32.mrf.mxu2 }
 0x1af   : > { %2363 = vmatpush.bf16.msrb.mxu3 %v4738_v58 }
 0x1b0   : > { %v1695_v8 = vpop.f32.mrf.mxu3 }
 0x1b3   : > { %v1822_v1 = vpop.f32.mrf.mxu0 }
 0x1b5   : > { %v1305_v15 = vpop.f32.mrf.mxu1 }
 0x1b6   : > { %v5658_v19 = vadd.f32 %v1305_v15, %v1205_v17  ;;  %v1495_v40 = vpop.f32.mrf.mxu2 }
 0x1b8   : > { %v5717_v14 = vpop.f32.mrf.mxu3 }
 0x1bd   : > { %v5665_v27 = vpop.f32.mrf.mxu1 }
 0x1be   : > { %v1498_v45 = vpop.f32.mrf.mxu2 }
 0x1c5   : > { %v1310_v17 = vpop.f32.mrf.mxu1 }
 0x1c6   : > { %v5674_v47 = vadd.f32 %v1310_v17, %v1207_v29  ;;  %v4743_v29 = vld [vmem:[%s6319_s6 + $0x50] sm:$0xff]  ;;  %v5700_v15 = vpop.f32.mrf.mxu2  ;;  %v1825_v17 = vpop.f32.mrf.mxu0 }
 0x1c7   : > { %2223 = vmatpush.bf16.msra.mxu2 %v4743_v29  ;;  %v5715_v29 = vld [vmem:[%s6318_s5] ss:$0 sm:$0xff] }
 0x1cb   : > { %2224 = vmatpush.bf16.msra.mxu2 %v4742_v24 }
 0x1cd   : > { %v5676_v26 = vpop.f32.mrf.mxu1 }
 0x1ce   : > { %v5726_v2 = vpop.f32.mrf.mxu2  ;;  %v1827_v58 = vpop.f32.mrf.mxu0 }
 0x1d5   : > { %v1315_v53 = vpop.f32.mrf.mxu1 }
 0x1d6   : > { %v5678_v52 = vadd.f32 %v1315_v53, %v1209_v43  ;;  %v1518_v43 = vadd.f32 %v1493_v12, %v1320_v63  ;;  %v1202_v63 = vadd.f32 %v5611_v54, %v996_v57  ;;  %v836_v57 = vadd.f32 %v5613_v39, %v5609_v32 }
 0x1d7   : > { %v1520_v32 = vadd.f32 %v1498_v45, %v5646_v30  ;;  %v5753_v45 = vpop.f32.mrf.mxu3 }
 0x1d8   : > { %v1715_v12 = vadd.f32 %v1690_v46, %v1518_v43  ;;  %v1321_v53 = vadd.f32 %v1297_v5, %v1202_v63  ;;  %v4737_v43 = vld [vmem:[%s6319_s6 + $0x20] sm:$0xff]  ;;  %v4736_v63 = vld [vmem:[%s6319_s6 + $0x18] sm:$0xff]  ;;  %v998_v30 = vadd.f32 %v5617_v28, %v836_v57 }
 0x1d9   : > { %v4753_v5 = vld [vmem:[%s6319_s6 + $0xa0] sm:$0xff]  ;;  %2364 = vmatpush.bf16.msrb.mxu3 %v4737_v43  ;;  %v4772_v28 = vld [vmem:[%s6319_s6 + $0x138] sm:$0xff] }
 0x1da   : > { %v1845_v59 = vadd.f32 %v1820_v20, %v1715_v12  ;;  %v1519_v46 = vadd.f32 %v1495_v40, %v1321_v53  ;;  %2505 = vmatpush.bf16.msrb.mxu0 %v4753_v5  ;;  %v4752_v12 = vld [vmem:[%s6319_s6 + $0x98] sm:$0xff]  ;;  %v4741_v53 = vld [vmem:[%s6319_s6 + $0x40] sm:$0xff]  ;;  %v1204_v43 = vadd.f32 %v5622_v6, %v998_v30  ;;  %v1717_v5 = vadd.f32 %v1695_v8, %v1520_v32  ;;  %v4750_v6 = vld [vmem:[%s6319_s6 + $0x88] sm:$0xff] }
 0x1db   : > { %2225 = vmatpush.bf16.msra.mxu2 %v4741_v53  ;;  %v2108_v53 = vld [vmem:[#allocation3] sm:$0x8] }
 0x1dc   : > { %v1716_v33 = vadd.f32 %v1692_v23, %v1519_v46  ;;  %v4764_v23 = vld [vmem:[%s6319_s6 + $0xf8] sm:$0xff]  ;;  %v4751_v46 = vld [vmem:[%s6319_s6 + $0x90] sm:$0xff]  ;;  %v1323_v8 = vadd.f32 %v5653_v10, %v1204_v43  ;;  %v4761_v10 = vld [vmem:[%s6319_s6 + $0xe0] sm:$0xff] }
 0x1dd   : > { %v5691_v25 = vpop.f32.mrf.mxu1  ;;  %2365 = vmatpush.bf16.msrb.mxu3 %v4736_v63  ;;  %2708 = vmatpush.bf16.msrb.mxu1 %v4764_v23  ;;  %v5770_v63 = vpop.f32.mrf.mxu2 }
 0x1de   : > { %v1846_v24 = vadd.f32 %v1822_v1, %v1716_v33  ;;  %v4735_v1 = vld [vmem:[%s6319_s6 + $0x10] sm:$0xff]  ;;  %2506 = vmatpush.bf16.msrb.mxu0 %v4752_v12  ;;  %v4734_v33 = vld [vmem:[%s6319_s6 + $0x8] sm:$0xff]  ;;  %v1521_v32 = vadd.f32 %v5700_v15, %v1323_v8  ;;  %v4749_v15 = vld [vmem:[%s6319_s6 + $0x80] sm:$0xff]  ;;  %v1522_v8 = vadd.f32 %v5726_v2, %v5658_v19 }
 0x1df   : > { %2827 = vmatpush.bf16.msrb.mxu2 %v4772_v28  ;;  %v4771_v19 = vld [vmem:[%s6319_s6 + $0x130] sm:$0xff] }
 0x1e1   : > { %2366 = vmatpush.bf16.msrb.mxu3 %v4735_v1 }
 0x1e2   : > { %2507 = vmatpush.bf16.msrb.mxu0 %v4751_v46 }
 0x1e3   : > { %2828 = vmatpush.bf16.msrb.mxu2 %v4771_v19 }
 0x1e5   : > { %v1972_v54 = vpop.f32.mrf.mxu1  ;;  %2367 = vmatpush.bf16.msrb.mxu3 %v4734_v33 }
 0x1e6   : > { %v1997_v9 = vadd.f32 %v1972_v54, %v1845_v59  ;;  %v4763_v59 = vld [vmem:[%s6319_s6 + $0xf0] sm:$0xff]  ;;  %2508 = vmatpush.bf16.msrb.mxu0 %v4750_v6 }
 0x1e7   : > { %2709 = vmatpush.bf16.msrb.mxu1 %v4763_v59  ;;  %v4733_v59 = vld [vmem:[%s6319_s6] sm:$0xff] }
 0x1e8   : > { %v2011_v20 = vadd.f32 %v5715_v29, %v1997_v9 }
 0x1e9   : > { %2368 = vmatpush.bf16.msrb.mxu3 %v4733_v59 }
 0x1ea   : > { %v2021_v40 = vmax.f32 %v2011_v20, 0.0  ;;  %2509 = vmatpush.bf16.msrb.mxu0 %v4749_v15 }
 0x1ec   : > { %v2031_v54 = vpack.c.bf16 %v2021_v40, %v2021_v40  ;;  %v4762_v40 = vld [vmem:[%s6319_s6 + $0xe8] sm:$0xff] }
 0x1ed   : > { %v1974_v42 = vpop.f32.mrf.mxu1  ;;  %2710 = vmatpush.bf16.msrb.mxu1 %v4762_v40 }
 0x1ee   : > { %v1998_v39 = vadd.f32 %v1974_v42, %v1846_v24  ;;  %v2041_v57 = vunpack.c.l.bf16 %v2031_v54  ;;  %v1847_v24 = vadd.f32 %v1825_v17, %v1717_v5  ;;  %v2082_v42 = vld [vmem:[#allocation3 + $0x4] sm:$0xf]  ;;  %v1830_v17 = vpop.f32.mrf.mxu0  ;;  %v1718_v5 = vadd.f32 %v5717_v14, %v1521_v32 }
 0x1ef   : > { %v2138_v43 = vunpack.c.l.b16 %v2082_v42  ;;  %v4760_v14 = vld [vmem:[%s6319_s6 + $0xd8] sm:$0xff] }
 0x1f0   : > { %v2012_v9 = vadd.f32 %v5715_v29, %v1998_v39  ;;  %v2051_v54 = vmul.f32 %v4816_v60, %v2041_v57  ;;  %v841_v60 = vadd.f32 %v5624_v4, %v5620_v34  ;;  %v1848_v28 = vadd.f32 %v1827_v58, %v1718_v5  ;;  %v4759_v34 = vld [vmem:[%s6319_s6 + $0xd0] sm:$0xff] }
 0x1f1   : > { %2711 = vmatpush.bf16.msrb.mxu1 %v4761_v10  ;;  %v1719_v10 = vadd.f32 %v5753_v45, %v1522_v8 }
 0x1f2   : > { %v2022_v20 = vmax.f32 %v2012_v9, 0.0  ;;  %v2137_v9 = vunpack.c.l.b16 %v2108_v53  ;;  %v1000_v4 = vadd.f32 %v5626_v56, %v841_v60  ;;  %v4758_v56 = vld [vmem:[%s6319_s6 + $0xc8] sm:$0xff] }
 0x1f3   : > { %v1849_v5 = vadd.f32 %v1830_v17, %v1719_v10  ;;  %v4757_v17 = vld [vmem:[%s6319_s6 + $0xc0] sm:$0xff] }
 0x1f4   : > { %v2032_v12 = vpack.c.bf16 %v2022_v20, %v2022_v20  ;;  %v5788_v20 = vpop.f32.mrf.mxu3  ;;  %v2148_v51 = vpack.c.b16 %v2138_v43, %v2137_v9  ;;  %v1206_v2 = vadd.f32 %v5631_v16, %v1000_v4 }
 0x1f5   : > { %v1977_v23 = vpop.f32.mrf.mxu1  ;;  %2712 = vmatpush.bf16.msrb.mxu1 %v4760_v14 }
 0x1f6   : > { %v2042_v39 = vunpack.c.l.bf16 %v2032_v12  ;;  %v1999_v1 = vadd.f32 %v1977_v23, %v1847_v24  ;;  %v5800_v24 = vpop.f32.mrf.mxu2  ;;  %v2417_v53 = vshrl.u32 %v2148_v51, 16  ;;  %v2420_v32 = vshll.u32 %v2148_v51, 16 }
 0x1f7   : > { %v2154_v9 = vrot.slane %v2148_v51, 3 }
 0x1f8   : > { %v2052_v46 = vmul.f32 %v4817_v0, %v2042_v39  ;;  %v2013_v30 = vadd.f32 %v5715_v29, %v1999_v1  ;;  %v2081_v0 = vld [vmem:[#allocation3] sm:$0xc]  ;;  %v1832_v39 = vpop.f32.mrf.mxu0  ;;  %v2422_v45 = vrot.slane %v2420_v32, 4 }
 0x1f9   : > { %v2253_v6 = vunpack.c.l.b16 %v2081_v0  ;;  %2713 = vmatpush.bf16.msrb.mxu1 %v4759_v34 }
 0x1fa   : > { %v5790_v33 = vpack.c.bf16 %v2052_v46, %v2051_v54  ;;  %v2023_v40 = vmax.f32 %v2013_v30, 0.0  ;;  %v1325_v46 = vadd.f32 %v5665_v27, %v1206_v2  ;;  %v846_v2 = vadd.f32 %v5633_v55, %v5629_v61 }
 0x1fb   : > { %v2254_v58 = vpack.c.b16 %v2138_v43, %v2253_v6 }
 0x1fc   : > { %4938 = vst [vmem:[#allocation3 + $0x8] sm:$0xff] %v5790_v33   ;;  %v2033_v12 = vpack.c.bf16 %v2023_v40, %v2023_v40  ;;  %v1705_v40 = vpop.f32.mrf.mxu3  ;;  %v1523_v0 = vadd.f32 %v5770_v63, %v1325_v46 }
 0x1fd   : > { %v1979_v57 = vpop.f32.mrf.mxu1  ;;  %v2256_v1 = vshrl.u32 %v2254_v58, 16  ;;  %v2259_v59 = vshll.u32 %v2254_v58, 16  ;;  %2714 = vmatpush.bf16.msrb.mxu1 %v4758_v56 }
 0x1fe   : > { %v2000_v23 = vadd.f32 %v1979_v57, %v1848_v28  ;;  %v2043_v54 = vunpack.c.l.bf16 %v2033_v12  ;;  %v2419_v28 = vrot.slane %v2417_v53, 3 }
 0x1ff   : > { %v2258_v43 = vrot.slane %v2256_v1, 2  ;;  %v2261_v16 = vrot.slane %v2259_v59, 3  ;;  %v4974_v59 = vld [vmem:[#allocation3 + $0x4] sm:$0x8] }
 0x200   : > { %v2014_v42 = vadd.f32 %v5715_v29, %v2000_v23  ;;  %v2053_v27 = vmul.f32 %v4820_v41, %v2043_v54  ;;  %v2423_v32 = vor.u32 %v2422_v45, %v2419_v28  ;;  %v1720_v54 = vadd.f32 %v5788_v20, %v1523_v0  ;;  %v1835_v31 = vpop.f32.mrf.mxu0  ;;  %v4770_v20 = vld [vmem:[%s6319_s6 + $0x128] sm:$0xff] }
 0x201   : > { %v2262_v23 = vor.u32 %v2261_v16, %v2258_v43  ;;  %2715 = vmatpush.bf16.msrb.mxu1 %v4757_v17  ;;  %v1002_v43 = vadd.f32 %v5635_v22, %v846_v2  ;;  %2829 = vmatpush.bf16.msrb.mxu2 %v4770_v20 }
 0x202   : > { %v2024_v15 = vmax.f32 %v2014_v42, 0.0  ;;  %v1510_v42 = vpop.f32.mrf.mxu2 }
 0x203   : > { %v5816_v30 = vld [vmem:[#allocation3 + $0x8] sm:$0xff]  ;;  %v1208_v45 = vadd.f32 %v5640_v35, %v1002_v43 }
 0x204   : > { %v2034_v60 = vpack.c.bf16 %v2024_v15, %v2024_v15  ;;  %v2155_v57 = vrot.slane %v5816_v30, 3  ;;  %v2264_v6 = vshrl.u32 %v5816_v30, 16  ;;  %v2267_v8 = vshll.u32 %v5816_v30, 16  ;;  %v5022_v10 = vld [vmem:[#allocation3 + $0x4] sm:$0xf0]  }
 0x205   : > { %v1982_v14 = vpop.f32.mrf.mxu1  ;;  %v4975_v55 = vor.u32 %v5022_v10, %v4974_v59  ;;  %v1327_v22 = vadd.f32 %v5676_v26, %v1208_v45 }
 0x206   : > { %v2044_v51 = vunpack.c.l.bf16 %v2034_v60  ;;  %v2001_v12 = vadd.f32 %v1982_v14, %v1849_v5  ;;  %v2156_v63 = vsel %vm610_vm0, %v2154_v9, %v2155_v57  ;;  %v2266_v34 = vrot.slane %v2264_v6, 2  ;;  %v1707_v60 = vpop.f32.mrf.mxu3 }
 0x207   : > { %v2269_v4 = vrot.slane %v2267_v8, 3  ;;  %v2424_v58 = vrot.slane %v2264_v6, 3  ;;  %2226 = vmatmul.bf16.vlgmr.msra.gmra.mxu2 %v2156_v63  ;;  %v2425_v19 = vrot.slane %v2267_v8, 4  ;;  %v1850_v9 = vadd.f32 %v1832_v39, %v1720_v54  ;;  %v4769_v8 = vld [vmem:[%s6319_s6 + $0x120] sm:$0xff] }
 0x208   : > { %v2054_v53 = vmul.f32 %v4821_v50, %v2044_v51  ;;  %v2015_v41 = vadd.f32 %v5715_v29, %v2001_v12  ;;  %v1524_v5 = vadd.f32 %v5800_v24, %v5674_v47  ;;  %v2603_v14 = vshrl.u32 %v4975_v55, 16  ;;  %2830 = vmatpush.bf16.msrb.mxu2 %v4769_v8 }
 0x209   : > { %v5835_v1 = vor.u32 %v2269_v4, %v2266_v34  ;;  %v5840_v46 = vor.u32 %v2425_v19, %v2424_v58  ;;  %v2606_v6 = vshll.u32 %v4975_v55, 16  ;;  %v851_v24 = vadd.f32 %v5660_v3, %v5638_v48 }
 0x20a   : > { %v5838_v15 = vpack.c.bf16 %v2054_v53, %v2053_v27  ;;  %v2025_v56 = vmax.f32 %v2015_v41, 0.0  ;;  %v1721_v27 = vadd.f32 %v1705_v40, %v1524_v5  ;;  %v1513_v51 = vpop.f32.mrf.mxu2  ;;  %v2605_v4 = vrot.slane %v2603_v14, 3  ;;  %v1837_v53 = vpop.f32.mrf.mxu0 }
 0x20b   : > { %v2271_v50 = vsel %vm712_vm1, %v2262_v23, %v5835_v1  ;;  %v2427_v61 = vsel %vm874_vm2, %v2423_v32, %v5840_v46  ;;  %v1525_v23 = vadd.f32 %v1510_v42, %v1327_v22  ;;  %v2608_v58 = vrot.slane %v2606_v6, 4 }
 0x20c   : > { %4939 = vst [vmem:[#allocation3 + $0x10] sm:$0xff] %v5838_v15   ;;  %2369 = vmatmul.bf16.vlgmr.msrb.gmra.mxu3 %v2271_v50  ;;  %2510 = vmatmul.bf16.vlgmr.msrb.gmra.mxu0 %v2427_v61  ;;  %v2035_v39 = vpack.c.bf16 %v2025_v56, %v2025_v56  ;;  %v1851_v63 = vadd.f32 %v1835_v31, %v1721_v27 }
 0x20d   : > { %v1984_v16 = vpop.f32.mrf.mxu1  ;;  %v1004_v55 = vadd.f32 %v5667_v13, %v851_v24  ;;  %v1722_v30 = vadd.f32 %v1707_v60, %v1525_v23  ;;  %v1526_v22 = vadd.f32 %v1513_v51, %v5678_v52  ;;  %v4784_v51 = vld [vmem:[%s6319_s6 + $0x170] sm:$0xff] }
 0x20e   : > { %v2002_v28 = vadd.f32 %v1984_v16, %v1850_v9  ;;  %v2045_v12 = vunpack.c.l.bf16 %v2035_v39  ;;  %v1710_v31 = vpop.f32.mrf.mxu3 }
 0x20f   : > { %v1210_v39 = vadd.f32 %v5672_v38, %v1004_v55  ;;  %v1852_v45 = vadd.f32 %v1837_v53, %v1722_v30  ;;  %v4768_v38 = vld [vmem:[%s6319_s6 + $0x118] sm:$0xff] }
 0x210   : > { %v2016_v0 = vadd.f32 %v5715_v29, %v2002_v28  ;;  %v2055_v48 = vmul.f32 %v4824_v11, %v2045_v12  ;;  %2831 = vmatpush.bf16.msrb.mxu2 %v4768_v38 }
 0x212   : > { %v2026_v47 = vmax.f32 %v2016_v0, 0.0  ;;  %v1515_v13 = vpop.f32.mrf.mxu2  ;;  %v1329_v0 = vadd.f32 %v5691_v25, %v1210_v39  ;;  %v4785_v25 = vld [vmem:[%s6319_s6 + $0x178] sm:$0xff]  ;;  %v1840_v23 = vpop.f32.mrf.mxu0 }
 0x213   : > { %v5861_v35 = vld [vmem:[#allocation3 + $0x10] sm:$0xff]  ;;  %3024 = vmatpush.bf16.msra.mxu3 %v4785_v25 }
 0x214   : > { %v5024_v17 = vld [vmem:[#allocation3 + $0xc] sm:$0xff]   ;;  %v2036_v34 = vpack.c.bf16 %v2026_v47, %v2026_v47  ;;  %v2157_v26 = vrot.slane %v5861_v35, 3  ;;  %v2273_v40 = vshrl.u32 %v5861_v35, 16  ;;  %v2276_v32 = vshll.u32 %v5861_v35, 16  ;;  %v4797_v47 = vld [vmem:[%s6319_s6 + $0x1b8] sm:$0xff] }
 0x215   : > { %v1987_v41 = vpop.f32.mrf.mxu1  ;;  %v2611_v19 = vshrl.u32 %v5024_v17, 16  ;;  %v2614_v2 = vshll.u32 %v5024_v17, 16  ;;  %v5899_v6 = vld [vmem:[#allocation3 + $0xc] sm:$0xff]   ;;  %v1527_v24 = vadd.f32 %v1515_v13, %v1329_v0  ;;  %3221 = vmatpush.bf16.msra.mxu0 %v4797_v47 }
 0x216   : > { %v2046_v3 = vunpack.c.l.bf16 %v2036_v34  ;;  %v2003_v42 = vadd.f32 %v1987_v41, %v1851_v63  ;;  %v2158_v59 = vsel %vm610_vm0, %v2155_v57, %v2157_v26  ;;  %v2275_v10 = vrot.slane %v2273_v40, 2  ;;  %v5051_v8 = vld [vmem:[#allocation3 + $0xc] sm:$0xf0]  ;;  %v5052_v17 = vld [vmem:[#allocation3 + $0xc] sm:$0xe]  ;;  %v4796_v63 = vld [vmem:[%s6319_s6 + $0x1b0] sm:$0xff] }
 0x217   : > { %v2278_v54 = vrot.slane %v2276_v32, 3  ;;  %v2428_v56 = vrot.slane %v2273_v40, 3  ;;  %2231 = vmatmul.bf16.gmra.mxu2 %v2158_v59  ;;  %v2429_v11 = vrot.slane %v2276_v32, 4  ;;  %v2613_v61 = vrot.slane %v2611_v19, 3  ;;  %v4766_v41 = vld [vmem:[%s6319_s6 + $0x108] sm:$0xff]  ;;  %3025 = vmatpush.bf16.msra.mxu3 %v4784_v51 }
 0x218   : > { %v2056_v50 = vmul.f32 %v4825_v21, %v2046_v3  ;;  %v2017_v9 = vadd.f32 %v5715_v29, %v2003_v42  ;;  %v2616_v43 = vrot.slane %v2614_v2, 4  ;;  %v2609_v21 = vor.u32 %v2608_v58, %v2605_v4  ;;  %v1712_v4 = vpop.f32.mrf.mxu3  ;;  %v4783_v42 = vld [vmem:[%s6319_s6 + $0x168] sm:$0xff] }
 0x219   : > { %v5877_v20 = vor.u32 %v2278_v54, %v2275_v10  ;;  %v5881_v5 = vor.u32 %v2429_v11, %v2428_v56  ;;  %v1723_v34 = vadd.f32 %v1710_v31, %v1526_v22  ;;  %v1724_v40 = vadd.f32 %v1712_v4, %v1527_v24  ;;  %3222 = vmatpush.bf16.msra.mxu0 %v4796_v63 }
 0x21a   : > { %v5879_v16 = vpack.c.bf16 %v2056_v50, %v2055_v48  ;;  %v2027_v57 = vmax.f32 %v2017_v9, 0.0  ;;  %v5887_v28 = vor.u32 %v2616_v43, %v2613_v61  ;;  %v5053_v2 = vor.u32 %v5052_v17, %v5051_v8  ;;  %v4795_v50 = vld [vmem:[%s6319_s6 + $0x1a8] sm:$0xff] }
 0x21b   : > { %v2280_v62 = vsel %vm712_vm1, %v5835_v1, %v5877_v20  ;;  %v2431_v60 = vsel %vm874_vm2, %v5840_v46, %v5881_v5  ;;  %v4767_v46 = vld [vmem:[%s6319_s6 + $0x110] sm:$0xff]  ;;  %v1853_v48 = vadd.f32 %v1840_v23, %v1723_v34  ;;  %3026 = vmatpush.bf16.msra.mxu3 %v4783_v42 }
 0x21c   : > { %4940 = vst [vmem:[#allocation3 + $0x18] sm:$0xff] %v5879_v16   ;;  %2374 = vmatmul.bf16.gmra.mxu3 %v2280_v62  ;;  %2515 = vmatmul.bf16.gmra.mxu0 %v2431_v60  ;;  %v2618_v1 = vsel %vm874_vm2, %v2609_v21, %v5887_v28  ;;  %v2037_v27 = vpack.c.bf16 %v2027_v57, %v2027_v57  ;;  %v1842_v60 = vpop.f32.mrf.mxu0  ;;  %v3416_v35 = vshrl.u32 %v5053_v2, 16  ;;  %v3286_v24 = vrot.slane %v5053_v2, 1 }
 0x21d   : > { %v1989_v14 = vpop.f32.mrf.mxu1  ;;  %2716 = vmatmul.bf16.vlgmr.msrb.gmra.mxu1 %v2618_v1  ;;  %2832 = vmatpush.bf16.msrb.mxu2 %v4767_v46  ;;  %v1854_v47 = vadd.f32 %v1842_v60, %v1724_v40  ;;  %v4793_v40 = vld [vmem:[%s6319_s6 + $0x198] sm:$0xff] }
 0x21e   : > { %v2004_v12 = vadd.f32 %v1989_v14, %v1852_v45  ;;  %v2047_v58 = vunpack.c.l.bf16 %v2037_v27  ;;  %3223 = vmatpush.bf16.msra.mxu0 %v4795_v50  ;;  %v3419_v14 = vshll.u32 %v5053_v2, 16  ;;  %v4782_v27 = vld [vmem:[%s6319_s6 + $0x160] sm:$0xff]  ;;  %v3418_v51 = vrot.slane %v3416_v35, 1 }
 0x21f   : > { %3027 = vmatpush.bf16.msra.mxu3 %v4782_v27 }
 0x220   : > { %v2018_v52 = vadd.f32 %v5715_v29, %v2004_v12  ;;  %v2057_v9 = vmul.f32 %v4828_v49, %v2047_v58  ;;  %v4794_v12 = vld [vmem:[%s6319_s6 + $0x1a0] sm:$0xff]  ;;  %v3421_v63 = vrot.slane %v3419_v14, 2 }
 0x221   : > { %2833 = vmatpush.bf16.msrb.mxu2 %v4766_v41  ;;  %v4781_v41 = vld [vmem:[%s6319_s6 + $0x158] sm:$0xff] }
 0x222   : > { %v2028_v53 = vmax.f32 %v2018_v52, 0.0  ;;  %3224 = vmatpush.bf16.msra.mxu0 %v4794_v12  ;;  %v6045_v12 = vld [vmem:[%s6319_s6 + $0x1e0] sm:$0xff] }
 0x223   : > { %v5921_v32 = vld [vmem:[#allocation3 + $0x18] sm:$0xff]  ;;  %3028 = vmatpush.bf16.msra.mxu3 %v4781_v41 }
 0x224   : > { %v5026_v19 = vld [vmem:[#allocation3 + $0x14] sm:$0xff]   ;;  %v2038_v3 = vpack.c.bf16 %v2028_v53, %v2028_v53  ;;  %v2159_v10 = vrot.slane %v5921_v32, 3  ;;  %v2282_v54 = vshrl.u32 %v5921_v32, 16  ;;  %v2285_v56 = vshll.u32 %v5921_v32, 16 }
 0x225   : > { %v1992_v59 = vpop.f32.mrf.mxu1  ;;  %v2620_v31 = vshrl.u32 %v5026_v19, 16  ;;  %v2623_v55 = vshll.u32 %v5026_v19, 16  ;;  %v5934_v43 = vld [vmem:[#allocation3 + $0x14] sm:$0xff]  ;;  %v4765_v19 = vld [vmem:[%s6319_s6 + $0x100] sm:$0xff] }
 0x226   : > { %v2048_v11 = vunpack.c.l.bf16 %v2038_v3  ;;  %v2005_v61 = vadd.f32 %v1992_v59, %v1853_v48  ;;  %v2160_v30 = vsel %vm610_vm0, %v2157_v26, %v2159_v10  ;;  %v2284_v57 = vrot.slane %v2282_v54, 2  ;;  %v5999_v48 = vld [vmem:[%s6319_s6 + $0x1f0] sm:$0xff]  ;;  %3225 = vmatpush.bf16.msra.mxu0 %v4793_v40  ;;  %2834 = vmatpush.bf16.msrb.mxu2 %v4765_v19 }
 0x227   : > { %v2287_v39 = vrot.slane %v2285_v56, 3  ;;  %v2432_v62 = vrot.slane %v2282_v54, 3  ;;  %2236 = vmatmul.bf16.gmra.mxu2 %v2160_v30  ;;  %v2433_v45 = vrot.slane %v2285_v56, 4  ;;  %v2622_v13 = vrot.slane %v2620_v31, 3  ;;  %v4780_v59 = vld [vmem:[%s6319_s6 + $0x150] sm:$0xff] }
 0x228   : > { %v2058_v21 = vmul.f32 %v4829_v18, %v2048_v11  ;;  %v2019_v49 = vadd.f32 %v5715_v29, %v2005_v61  ;;  %v2625_v0 = vrot.slane %v2623_v55, 4  ;;  %v3132_v37 = vshll.u32 %v5934_v43, 16  ;;  %v4792_v54 = vld [vmem:[%s6319_s6 + $0x190] sm:$0xff]  ;;  %v6019_v11 = vld [vmem:[%s6319_s6 + $0x1e8] sm:$0xff]  ;;  %3029 = vmatpush.bf16.msra.mxu3 %v4780_v59 }
 0x229   : > { %v5944_v38 = vor.u32 %v2287_v39, %v2284_v57  ;;  %v5948_v8 = vor.u32 %v2433_v45, %v2432_v62  ;;  %v3287_v46 = vrot.slane %v5934_v43, 1  ;;  %v3136_v25 = vshrl.u32 %v5934_v43, 16  ;;  %v4779_v45 = vld [vmem:[%s6319_s6 + $0x148] sm:$0xff] }
 0x22a   : > { %v5946_v26 = vpack.c.bf16 %v2058_v21, %v2057_v9  ;;  %v2029_v1 = vmax.f32 %v2019_v49, 0.0  ;;  %v5954_v22 = vor.u32 %v2625_v0, %v2622_v13  ;;  %v3424_v58 = vrot.slane %v3132_v37, 2  ;;  %3226 = vmatpush.bf16.msra.mxu0 %v4792_v54  ;;  %v4791_v13 = vld [vmem:[%s6319_s6 + $0x188] sm:$0xff] }
 0x22b   : > { %v2289_v18 = vsel %vm712_vm1, %v5877_v20, %v5944_v38  ;;  %v2435_v20 = vsel %vm874_vm2, %v5881_v5, %v5948_v8  ;;  %v3423_v52 = vrot.slane %v3136_v25, 1  ;;  %v5976_v5 = vld [vmem:[%s6319_s6 + $0x1f8] sm:$0xff] }
 0x22c   : > { %4941 = vst [vmem:[#allocation3 + $0x20] sm:$0xff] %v5946_v26   ;;  %2379 = vmatmul.bf16.gmra.mxu3 %v2289_v18  ;;  %2520 = vmatmul.bf16.gmra.mxu0 %v2435_v20  ;;  %v2627_v17 = vsel %vm874_vm2, %v5887_v28, %v5954_v22  ;;  %v2039_v34 = vpack.c.bf16 %v2029_v1, %v2029_v1 }
 0x22d   : > { %v1994_v23 = vpop.f32.mrf.mxu1  ;;  %2721 = vmatmul.bf16.gmra.mxu1 %v2627_v17  ;;  %v5983_v28 = vsel %vm1746_vm5, %v3286_v24, %v3287_v46  ;;  %v6001_v3 = vor.u32 %v3424_v58, %v3423_v52  ;;  %3030 = vmatpush.bf16.msra.mxu3 %v4779_v45  ;;  %v4778_v17 = vld [vmem:[%s6319_s6 + $0x140] sm:$0xff] }
 0x22e   : > { %v2006_v4 = vadd.f32 %v1994_v23, %v1854_v47  ;;  %5004 = vmatpush.bf16.msra.mxu1 %v5976_v5  ;;  %v2049_v42 = vunpack.c.l.bf16 %v2039_v34  ;;  %3227 = vmatpush.bf16.msra.mxu0 %v4791_v13  ;;  %v4813_v23 = vld [vmem:[%s6319_s6 + $0x238] sm:$0xff]  ;;  %v4790_v52 = vld [vmem:[%s6319_s6 + $0x180] sm:$0xff] }
 0x22f   : > { %3501 = vmatpush.bf16.msra.mxu2 %v4813_v23  ;;  %v4801_v34 = vld [vmem:[%s6319_s6 + $0x1d8] sm:$0xff] }
 0x230   : > { %v2020_v53 = vadd.f32 %v5715_v29, %v2006_v4  ;;  %v3422_v29 = vor.u32 %v3421_v63, %v3418_v51  ;;  %v2059_v62 = vmul.f32 %v4832_v44, %v2049_v42 }
 0x231   : > { %3031 = vmatpush.bf16.msra.mxu3 %v4778_v17 }
 0x232   : > { %v2030_v2 = vmax.f32 %v2020_v53, 0.0  ;;  %v6013_v50 = vsel %vm1876_vm3, %v3422_v29, %v6001_v3  ;;  %5005 = vmatpush.bf16.msra.mxu1 %v5999_v48  ;;  %3228 = vmatpush.bf16.msra.mxu0 %v4790_v52  ;;  %v4773_v52 = vld [vmem:[#allocation3 + $0x8] sm:$0xff] }
 0x233   : > { %v6009_v56 = vld [vmem:[#allocation3 + $0x20] sm:$0xff] }
 0x234   : > { %v5028_v31 = vld [vmem:[#allocation3 + $0x1c] sm:$0xff]   ;;  %v2040_v9 = vpack.c.bf16 %v2030_v2, %v2030_v2  ;;  %v2161_v61 = vrot.slane %v6009_v56, 3  ;;  %v2291_v55 = vshrl.u32 %v6009_v56, 16  ;;  %v2294_v30 = vshll.u32 %v6009_v56, 16  ;;  %v6101_v2 = vld [vmem:[%s6319_s6 + $0x1c8] sm:$0xff] }
 0x235   : > { %v2629_v57 = vshrl.u32 %v5028_v31, 16  ;;  %v6024_v39 = vld [vmem:[#allocation3 + $0x1c] sm:$0xff]  ;;  %v2632_v49 = vshll.u32 %v5028_v31, 16 }
 0x236   : > { %v2050_v21 = vunpack.c.l.bf16 %v2040_v9  ;;  %v2162_v60 = vsel %vm610_vm0, %v2159_v10, %v2161_v61  ;;  %v2293_v0 = vrot.slane %v2291_v55, 2  ;;  %v2296_v44 = vrot.slane %v2294_v30, 3  ;;  %5006 = vmatpush.bf16.msra.mxu1 %v6019_v11  ;;  %3350 = vmatpush.bf16.msrb.mxu0 %v5976_v5 }
 0x237   : > { %v2436_v35 = vrot.slane %v2291_v55, 3  ;;  %2241 = vmatmul.bf16.gmra.mxu2 %v2162_v60  ;;  %v2437_v1 = vrot.slane %v2294_v30, 4  ;;  %v2631_v18 = vrot.slane %v2629_v57, 3  ;;  %v2634_v27 = vrot.slane %v2632_v49, 4 }
 0x238   : > { %v2060_v14 = vmul.f32 %v4833_v7, %v2050_v21  ;;  %v6047_v32 = vor.u32 %v2296_v44, %v2293_v0  ;;  %v3140_v10 = vshll.u32 %v6024_v39, 16  ;;  %v3144_v7 = vshrl.u32 %v6024_v39, 16  ;;  %v6108_v21 = vld [vmem:[%s6319_s6 + $0x1c0] sm:$0xff] }
 0x239   : > { %v6052_v20 = vor.u32 %v2437_v1, %v2436_v35  ;;  %v2635_v36 = vor.u32 %v2634_v27, %v2631_v18 }
 0x23a   : > { %v6050_v47 = vpack.c.bf16 %v2060_v14, %v2059_v62  ;;  %v2298_v24 = vsel %vm712_vm1, %v5944_v38, %v6047_v32  ;;  %5007 = vmatpush.bf16.msra.mxu1 %v6045_v12  ;;  %v3427_v63 = vrot.slane %v3144_v7, 1  ;;  %v3428_v4 = vrot.slane %v3140_v10, 2  ;;  %3351 = vmatpush.bf16.msrb.mxu0 %v5999_v48 }
 0x23b   : > { %v2439_v51 = vsel %vm874_vm2, %v5948_v8, %v6052_v20  ;;  %v2636_v38 = vsel %vm874_vm2, %v5954_v22, %v2635_v36  ;;  %v6084_v8 = vld [vmem:[%s6319_s6 + $0x1d0] sm:$0xff] }
 0x23c   : > { %4942 = vst [vmem:[#allocation3 + $0x28] sm:$0xff] %v6050_v47   ;;  %2384 = vmatmul.bf16.gmra.mxu3 %v2298_v24  ;;  %2525 = vmatmul.bf16.gmra.mxu0 %v2439_v51  ;;  %v4812_v22 = vld [vmem:[%s6319_s6 + $0x230] sm:$0xff]  ;;  %v6090_v58 = vor.u32 %v3428_v4, %v3427_v63  ;;  %v4923_v1 = vunpack.c.h.b16 %v6050_v47  ;;  %v4774_v63 = vld [vmem:[#allocation3 + $0x10] sm:$0xff] }
 0x23d   : > { %2726 = vmatmul.bf16.gmra.mxu1 %v2636_v38  ;;  %3502 = vmatpush.bf16.msra.mxu2 %v4812_v22 }
 0x23e   : > { %5008 = vmatpush.bf16.msra.mxu1 %v4801_v34  ;;  %v6095_v53 = vsel %vm1876_vm3, %v6001_v3, %v6090_v58  ;;  %3352 = vmatpush.bf16.msrb.mxu0 %v6019_v11  ;;  %v2601_v23 = vpack.c.b16 %v4923_v1, %v4923_v1 }
 0x240   : > { %v2647_v22 = vshrl.u32 %v2601_v23, 16 }
 0x242   : > { %5009 = vmatpush.bf16.msra.mxu1 %v6084_v8  ;;  %3353 = vmatpush.bf16.msrb.mxu0 %v6045_v12  ;;  %v4811_v12 = vld [vmem:[%s6319_s6 + $0x228] sm:$0xff] }
 0x243   : > { %v2091_v41 = vld [vmem:[#allocation3 + $0x28] sm:$0x7]  ;;  %v6118_v18 = vld [vmem:[#allocation3 + $0x2c] sm:$0xff]  ;;  %3503 = vmatpush.bf16.msra.mxu2 %v4811_v12 }
 0x244   : > { %v5029_v40 = vld [vmem:[#allocation3 + $0x24] sm:$0xff]   ;;  %v2147_v29 = vunpack.c.l.b16 %v2091_v41  ;;  %v3156_v17 = vshll.u32 %v6118_v18, 16  ;;  %v3160_v51 = vshrl.u32 %v6118_v18, 16  ;;  %v2650_v41 = vshll.u32 %v2601_v23, 16 }
 0x245   : > { %v2395_v19 = vld [vmem:[#allocation3 + $0x28] sm:$0xf]  ;;  %v2638_v5 = vshrl.u32 %v5029_v40, 16  ;;  %v2641_v59 = vshll.u32 %v5029_v40, 16 }
 0x246   : > { %v2414_v42 = vunpack.c.l.b16 %v2395_v19  ;;  %v2153_v54 = vpack.c.b16 %v2147_v29, %v2147_v29  ;;  %5010 = vmatpush.bf16.msra.mxu1 %v6101_v2  ;;  %v6111_v45 = vld [vmem:[#allocation3 + $0x24] sm:$0xff]  ;;  %3354 = vmatpush.bf16.msrb.mxu0 %v4801_v34  ;;  %v3435_v4 = vrot.slane %v3160_v51, 1  ;;  %v3436_v34 = vrot.slane %v3156_v17, 2 }
 0x247   : > { %v2640_v3 = vrot.slane %v2638_v5, 3  ;;  %v2643_v9 = vrot.slane %v2641_v59, 4  ;;  %v3148_v56 = vshll.u32 %v6111_v45, 16  ;;  %v2930_v19 = vshll.u32 %v4773_v52, 16 }
 0x248   : > { %v2415_v31 = vpack.c.b16 %v2414_v42, %v2414_v42  ;;  %v2163_v55 = vrot.slane %v2153_v54, 3  ;;  %v2300_v30 = vshrl.u32 %v2153_v54, 16  ;;  %v2303_v57 = vshll.u32 %v2153_v54, 16 }
 0x249   : > { %v2644_v48 = vor.u32 %v2643_v9, %v2640_v3  ;;  %v3127_v29 = vshll.u32 %v5899_v6, 16  ;;  %v6150_v5 = vor.u32 %v3436_v34, %v3435_v4  ;;  %v2935_v59 = vshll.u32 %v4774_v63, 16  ;;  %v4777_v4 = vld [vmem:[#allocation3 + $0x28] sm:$0xff] }
 0x24a   : > { %v2441_v62 = vshrl.u32 %v2415_v31, 16  ;;  %v2444_v49 = vshll.u32 %v2415_v31, 16  ;;  %v2164_v13 = vsel %vm610_vm0, %v2161_v61, %v2163_v55  ;;  %v2302_v60 = vrot.slane %v2300_v30, 2  ;;  %5011 = vmatpush.bf16.msra.mxu1 %v6108_v21  ;;  %3355 = vmatpush.bf16.msrb.mxu0 %v6084_v8 }
 0x24b   : > { %v2305_v0 = vrot.slane %v2303_v57, 3  ;;  %2246 = vmatmul.bf16.gmra.mxu2 %v2164_v13  ;;  %v2645_v35 = vsel %vm874_vm2, %v2635_v36, %v2644_v48  ;;  %v3152_v61 = vshrl.u32 %v6111_v45, 16  ;;  %v2649_v54 = vrot.slane %v2647_v22, 3 }
 0x24c   : > { %v2443_v44 = vrot.slane %v2441_v62, 3  ;;  %v2446_v14 = vrot.slane %v2444_v49, 4  ;;  %v2652_v31 = vrot.slane %v2650_v41, 4  ;;  %v2932_v9 = vrot.slane %v2930_v19, 1  ;;  %v2881_v19 = vld [vmem:[#allocation3 + $0x30] sm:$0x1] }
 0x24d   : > { %v2306_v11 = vor.u32 %v2305_v0, %v2302_v60  ;;  %2731 = vmatmul.bf16.gmra.mxu1 %v2645_v35  ;;  %v3431_v38 = vrot.slane %v3152_v61, 1  ;;  %v3129_v55 = vrot.slane %v3127_v29, 1  ;;  %v2928_v30 = vshrl.u32 %v4773_v52, 16 }
 0x24e   : > { %v2447_v27 = vor.u32 %v2446_v14, %v2443_v44  ;;  %3356 = vmatpush.bf16.msrb.mxu0 %v6101_v2  ;;  %v2937_v8 = vrot.slane %v2935_v59, 1  ;;  %v3125_v57 = vshrl.u32 %v5899_v6, 16  ;;  %v3134_v62 = vrot.slane %v3132_v37, 1  ;;  %v4775_v6 = vld [vmem:[#allocation3 + $0x18] sm:$0xff] }
 0x24f   : > { %v2307_v24 = vsel %vm712_vm1, %v6047_v32, %v2306_v11  ;;  %v3432_v32 = vrot.slane %v3148_v56, 2  ;;  %v2933_v49 = vor.u32 %v2932_v9, %v2928_v30  ;;  %v2943_v37 = vshll.u32 %v4775_v6, 16  ;;  %v3078_v9 = vld [vmem:[#allocation3 + $0x34] sm:$0x1] }
 0x250   : > { %2389 = vmatmul.bf16.gmra.mxu3 %v2307_v24  ;;  %v2448_v36 = vsel %vm874_vm2, %v6052_v20, %v2447_v27  ;;  %v4810_v20 = vld [vmem:[%s6319_s6 + $0x220] sm:$0xff]  ;;  %v3130_v60 = vor.u32 %v3129_v55, %v3125_v57  ;;  %v3289_v44 = vrot.slane %v6024_v39, 1  ;;  %v3138_v11 = vor.u32 %v3136_v25, %v3134_v62  ;;  %v4808_v24 = vld [vmem:[%s6319_s6 + $0x210] sm:$0xff] }
 0x251   : > { %2530 = vmatmul.bf16.gmra.mxu0 %v2448_v36  ;;  %v3433_v40 = vor.u32 %v3432_v32, %v3431_v38  ;;  %3504 = vmatpush.bf16.msra.mxu2 %v4810_v20  ;;  %v2938_v0 = vsel %vm1386_vm4, %v2933_v49, %v2937_v8  ;;  %v2945_v35 = vrot.slane %v2943_v37, 1  ;;  %v3291_v25 = vrot.slane %v6111_v45, 1 }
 0x252   : > { %3357 = vmatpush.bf16.msrb.mxu0 %v6108_v21  ;;  %v3135_v2 = vsel %vm1386_vm4, %v3130_v60, %v3134_v62  ;;  %v3142_v21 = vrot.slane %v3140_v10, 1  ;;  %v3290_v1 = vsel %vm1746_vm5, %v3287_v46, %v3289_v44  ;;  %v4776_v10 = vld [vmem:[#allocation3 + $0x20] sm:$0xff]  ;;  %v4807_v46 = vld [vmem:[%s6319_s6 + $0x208] sm:$0xff]  ;;  %v2947_v36 = vshrl.u32 %v4775_v6, 16 }
 0x253   : > { %v6148_v42 = vsel %vm1876_vm3, %v6090_v58, %v3433_v40  ;;  %v6154_v3 = vsel %vm1876_vm3, %v3433_v40, %v6150_v5  ;;  %v2653_v58 = vor.u32 %v2652_v31, %v2649_v54  ;;  %v2951_v43 = vshll.u32 %v4776_v10, 16 }
 0x254   : > { %v3150_v52 = vrot.slane %v3148_v56, 1  ;;  %v2949_v12 = vor.u32 %v2947_v36, %v2945_v35  ;;  %v3292_v38 = vsel %vm1746_vm5, %v3289_v44, %v3291_v25  ;;  %v3146_v32 = vor.u32 %v3144_v7, %v3142_v21 }
 0x255   : > { %v2654_v13 = vsel %vm874_vm2, %v2644_v48, %v2653_v58  ;;  %v2939_v48 = vshrl.u32 %v4774_v63, 16  ;;  %v2953_v23 = vrot.slane %v2951_v43, 1  ;;  %v2959_v56 = vshll.u32 %v4777_v4, 16 }
 0x256   : > { %v3151_v20 = vsel %vm1386_vm4, %v3146_v32, %v3150_v52  ;;  %v3293_v22 = vrot.slane %v6118_v18, 1  ;;  %v2955_v40 = vshrl.u32 %v4776_v10, 16  ;;  %v3154_v34 = vor.u32 %v3152_v61, %v3150_v52 }
 0x257   : > { %v2941_v14 = vor.u32 %v2939_v48, %v2937_v8  ;;  %v2954_v63 = vsel %vm1386_vm4, %v2949_v12, %v2953_v23  ;;  %v2961_v39 = vrot.slane %v2959_v56, 1  ;;  %v3158_v54 = vrot.slane %v3156_v17, 1 }
 0x258   : > { %v2957_v29 = vor.u32 %v2955_v40, %v2953_v23  ;;  %v3294_v59 = vsel %vm1746_vm5, %v3291_v25, %v3293_v22  ;;  %v2920_v55 = vunpack.c.l.b16 %v2881_v19  ;;  %v3117_v45 = vunpack.c.l.b16 %v3078_v9 }
 0x259   : > { %v2946_v27 = vsel %vm1386_vm4, %v2941_v14, %v2945_v35  ;;  %v3159_v30 = vsel %vm1386_vm4, %v3154_v34, %v3158_v54 }
 0x25a   : > { %v2962_v31 = vsel %vm1386_vm4, %v2957_v29, %v2961_v39  ;;  %v2926_v57 = vpack.c.b16 %v2920_v55, %v2920_v55  ;;  %v3123_v49 = vpack.c.b16 %v3117_v45, %v3117_v45 }
 0x25b   : > { %2835 = vmatmul.bf16.vlgmr.msrb.gmra.mxu2 %v5790_v33  ;;  %v4809_v33 = vld [vmem:[%s6319_s6 + $0x218] sm:$0xff] }
 0x25c   : > { %3505 = vmatpush.bf16.msra.mxu2 %v4809_v33  ;;  %v3164_v60 = vshll.u32 %v3123_v49, 16  ;;  %v3295_v33 = vrot.slane %v3123_v49, 1 }
 0x25d   : > { %2736 = vmatmul.bf16.gmra.mxu1 %v2654_v13  ;;  %v2967_v13 = vshll.u32 %v2926_v57, 16 }
 0x25e   : > { %v3166_v14 = vrot.slane %v3164_v60, 1 }
 0x25f   : > { %v2969_v44 = vrot.slane %v2967_v13, 1 }
 0x260   : > { %3032 = vmatmul.bf16.vlgmr.msra.gmra.mxu3 %v2938_v0  ;;  %3506 = vmatpush.bf16.msra.mxu2 %v4808_v24 }
 0x261   : > { %3229 = vmatmul.bf16.vlgmr.msra.gmra.mxu0 %v3135_v2  ;;  %v2963_v2 = vshrl.u32 %v4777_v4, 16 }
 0x263   : > { %v2965_v37 = vor.u32 %v2963_v2, %v2961_v39 }
 0x264   : > { %3507 = vmatpush.bf16.msra.mxu2 %v4807_v46 }
 0x26b   : > { %2840 = vmatmul.bf16.gmra.mxu2 %v5838_v15  ;;  %v3143_v15 = vsel %vm1386_vm4, %v3138_v11, %v3142_v21  ;;  %v3162_v21 = vor.u32 %v3160_v51, %v3158_v54  ;;  %v2970_v11 = vsel %vm1386_vm4, %v2965_v37, %v2969_v44 }
 0x26d   : > { %3363 = vmatmul.bf16.vlgmr.msra.gmra.mxu1 %v3290_v1  ;;  %v3296_v1 = vsel %vm1746_vm5, %v3293_v22, %v3295_v33 }
 0x270   : > { %3037 = vmatmul.bf16.gmra.mxu3 %v2946_v27  ;;  %v3167_v27 = vsel %vm1386_vm4, %v3162_v21, %v3166_v14 }
 0x271   : > { %3234 = vmatmul.bf16.gmra.mxu0 %v3143_v15 }
 0x27b   : > { %2845 = vmatmul.bf16.gmra.mxu2 %v5879_v16  ;;  %v4806_v16 = vld [vmem:[%s6319_s6 + $0x200] sm:$0xff] }
 0x27c   : > { %3508 = vmatpush.bf16.msra.mxu2 %v4806_v16 }
 0x27d   : > { %3368 = vmatmul.bf16.gmra.mxu1 %v3292_v38 }
 0x280   : > { %3042 = vmatmul.bf16.gmra.mxu3 %v2954_v63 }
 0x281   : > { %3239 = vmatmul.bf16.gmra.mxu0 %v3151_v20 }
 0x289   : > { %v2511_v41 = vpop.f32.mrf.mxu0 }
 0x28a   : > { %v2227_v7 = vpop.f32.mrf.mxu2 }
 0x28b   : > { %2850 = vmatmul.bf16.gmra.mxu2 %v5946_v26 }
 0x28d   : > { %3373 = vmatmul.bf16.gmra.mxu1 %v3294_v59 }
 0x28f   : > { %v2370_v26 = vpop.f32.mrf.mxu3 }
 0x290   : > { %3047 = vmatmul.bf16.gmra.mxu3 %v2962_v31  ;;  %v2371_v8 = vadd.f32 %v2370_v26, %v2227_v7 }
 0x291   : > { %3244 = vmatmul.bf16.gmra.mxu0 %v3159_v30  ;;  %v2513_v61 = vpop.f32.mrf.mxu0 }
 0x292   : > { %v6206_v58 = vadd.f32 %v2511_v41, %v2371_v8  ;;  %v2229_v62 = vpop.f32.mrf.mxu2 }
 0x297   : > { %v2372_v17 = vpop.f32.mrf.mxu3 }
 0x298   : > { %v2373_v0 = vadd.f32 %v2372_v17, %v2229_v62 }
 0x299   : > { %v2516_v6 = vpop.f32.mrf.mxu0 }
 0x29a   : > { %v6208_v48 = vadd.f32 %v2513_v61, %v2373_v0  ;;  %v2232_v35 = vpop.f32.mrf.mxu2  ;;  %v2717_v7 = vpop.f32.mrf.mxu1 }
 0x29b   : > { %2855 = vmatmul.bf16.gmra.mxu2 %v6050_v47  ;;  %v2742_v49 = vadd.f32 %v2717_v7, %v6206_v58 }
 0x29d   : > { %3378 = vmatmul.bf16.gmra.mxu1 %v3296_v1 }
 0x29f   : > { %v2375_v24 = vpop.f32.mrf.mxu3 }
 0x2a0   : > { %3052 = vmatmul.bf16.gmra.mxu3 %v2970_v11  ;;  %v2376_v15 = vadd.f32 %v2375_v24, %v2232_v35 }
 0x2a1   : > { %3249 = vmatmul.bf16.gmra.mxu0 %v3167_v27  ;;  %v2518_v10 = vpop.f32.mrf.mxu0 }
 0x2a2   : > { %v6216_v46 = vadd.f32 %v2516_v6, %v2376_v15  ;;  %v2234_v47 = vpop.f32.mrf.mxu2  ;;  %v2719_v54 = vpop.f32.mrf.mxu1 }
 0x2a3   : > { %v2743_v35 = vadd.f32 %v2719_v54, %v6208_v48 }
 0x2a7   : > { %v2377_v43 = vpop.f32.mrf.mxu3 }
 0x2a8   : > { %v2378_v25 = vadd.f32 %v2377_v43, %v2234_v47 }
 0x2a9   : > { %v2521_v18 = vpop.f32.mrf.mxu0 }
 0x2aa   : > { %v6218_v51 = vadd.f32 %v2518_v10, %v2378_v25  ;;  %v2237_v36 = vpop.f32.mrf.mxu2  ;;  %v2722_v62 = vpop.f32.mrf.mxu1 }
 0x2ab   : > { %3509 = vmatmul.bf16.vlgmr.msra.gmra.mxu2 %v6013_v50  ;;  %v2744_v10 = vadd.f32 %v2722_v62, %v6216_v46 }
 0x2af   : > { %v2380_v23 = vpop.f32.mrf.mxu3 }
 0x2b0   : > { %v2381_v52 = vadd.f32 %v2380_v23, %v2237_v36 }
 0x2b1   : > { %3358 = vmatmul.bf16.vlgmr.msrb.gmra.mxu0 %v5983_v28  ;;  %v2523_v12 = vpop.f32.mrf.mxu0 }
 0x2b2   : > { %v6222_v38 = vadd.f32 %v2521_v18, %v2381_v52  ;;  %v2239_v32 = vpop.f32.mrf.mxu2  ;;  %v2724_v14 = vpop.f32.mrf.mxu1 }
 0x2b3   : > { %v2745_v52 = vadd.f32 %v2724_v14, %v6218_v51 }
 0x2b7   : > { %v2382_v63 = vpop.f32.mrf.mxu3 }
 0x2b8   : > { %v2383_v20 = vadd.f32 %v2382_v63, %v2239_v32 }
 0x2b9   : > { %v2526_v4 = vpop.f32.mrf.mxu0 }
 0x2ba   : > { %v6224_v16 = vadd.f32 %v2523_v12, %v2383_v20  ;;  %v2242_v56 = vpop.f32.mrf.mxu2  ;;  %v2727_v48 = vpop.f32.mrf.mxu1 }
 0x2bb   : > { %3514 = vmatmul.bf16.gmra.mxu2 %v6095_v53  ;;  %v3394_v53 = vld [vmem:[#allocation3 + $0x34] sm:$0x3]  ;;  %v2746_v46 = vadd.f32 %v2727_v48, %v6222_v38 }
 0x2bc   : > { %v3413_v8 = vunpack.c.l.b16 %v3394_v53 }
 0x2be   : > { %v3414_v61 = vpack.c.b16 %v3413_v8, %v3413_v8 }
 0x2bf   : > { %v2385_v22 = vpop.f32.mrf.mxu3 }
 0x2c0   : > { %v2386_v41 = vadd.f32 %v2385_v22, %v2242_v56  ;;  %v3440_v60 = vshrl.u32 %v3414_v61, 16  ;;  %v3443_v0 = vshll.u32 %v3414_v61, 16 }
 0x2c1   : > { %v2528_v40 = vpop.f32.mrf.mxu0 }
 0x2c2   : > { %v6227_v50 = vadd.f32 %v2526_v4, %v2386_v41  ;;  %v2244_v39 = vpop.f32.mrf.mxu2  ;;  %v3442_v6 = vrot.slane %v3440_v60, 1  ;;  %v3445_v37 = vrot.slane %v3443_v0, 2 }
 0x2c7   : > { %v2387_v28 = vpop.f32.mrf.mxu3 }
 0x2c8   : > { %v2388_v34 = vadd.f32 %v2387_v28, %v2244_v39 }
 0x2ca   : > { %v6229_v19 = vadd.f32 %v2528_v40, %v2388_v34 }
 0x2cb   : > { %3519 = vmatmul.bf16.gmra.mxu2 %v6148_v42 }
 0x2ce   : > { %v2531_v29 = vpop.f32.mrf.mxu0  ;;  %v2247_v59 = vpop.f32.mrf.mxu2 }
 0x2d3   : > { %v2390_v31 = vpop.f32.mrf.mxu3 }
 0x2d4   : > { %v2391_v9 = vadd.f32 %v2390_v31, %v2247_v59 }
 0x2d6   : > { %v2533_v55 = vpop.f32.mrf.mxu0  ;;  %v6232_v30 = vadd.f32 %v2531_v29, %v2391_v9  ;;  %v2249_v26 = vpop.f32.mrf.mxu2 }
 0x2db   : > { %v2392_v45 = vpop.f32.mrf.mxu3  ;;  %3524 = vmatmul.bf16.gmra.mxu2 %v6154_v3  ;;  %v3446_v3 = vor.u32 %v3445_v37, %v3442_v6 }
 0x2dc   : > { %v2393_v57 = vadd.f32 %v2392_v45, %v2249_v26 }
 0x2dd   : > { %v3447_v24 = vsel %vm1876_vm3, %v6150_v5, %v3446_v3  ;;  %v2729_v5 = vpop.f32.mrf.mxu1 }
 0x2de   : > { %v3230_v42 = vpop.f32.mrf.mxu0  ;;  %v6236_v13 = vadd.f32 %v2533_v55, %v2393_v57  ;;  %v2836_v17 = vpop.f32.mrf.mxu2  ;;  %v2747_v51 = vadd.f32 %v2729_v5, %v6224_v16 }
 0x2df   : > { %v2861_v2 = vadd.f32 %v2836_v17, %v2742_v49 }
 0x2e3   : > { %v3033_v33 = vpop.f32.mrf.mxu3 }
 0x2e4   : > { %v3058_v44 = vadd.f32 %v3033_v33, %v2861_v2 }
 0x2e5   : > { %v2732_v34 = vpop.f32.mrf.mxu1 }
 0x2e6   : > { %v3232_v21 = vpop.f32.mrf.mxu0  ;;  %v2838_v1 = vpop.f32.mrf.mxu2  ;;  %v6239_v27 = vadd.f32 %v3230_v42, %v3058_v44  ;;  %v2748_v55 = vadd.f32 %v2732_v34, %v6227_v50 }
 0x2e7   : > { %v2862_v11 = vadd.f32 %v2838_v1, %v2743_v35 }
 0x2eb   : > { %v3035_v58 = vpop.f32.mrf.mxu3  ;;  %3529 = vmatmul.bf16.gmra.mxu2 %v3447_v24 }
 0x2ec   : > { %v3059_v15 = vadd.f32 %v3035_v58, %v2862_v11 }
 0x2ed   : > { %v2734_v8 = vpop.f32.mrf.mxu1 }
 0x2ee   : > { %v3235_v47 = vpop.f32.mrf.mxu0  ;;  %v2841_v43 = vpop.f32.mrf.mxu2  ;;  %v6244_v18 = vadd.f32 %v3232_v21, %v3059_v15  ;;  %v2749_v49 = vadd.f32 %v2734_v8, %v6229_v19 }
 0x2ef   : > { %v2863_v25 = vadd.f32 %v2841_v43, %v2744_v10 }
 0x2f3   : > { %v3038_v36 = vpop.f32.mrf.mxu3 }
 0x2f4   : > { %v3060_v23 = vadd.f32 %v3038_v36, %v2863_v25  ;;  %v6273_v36 = vld [vmem:[%s6320_s7] ss:$0 sm:$0xff] }
 0x2f5   : > { %v2737_v0 = vpop.f32.mrf.mxu1 }
 0x2f6   : > { %v6247_v12 = vadd.f32 %v3235_v47, %v3060_v23  ;;  %v3237_v32 = vpop.f32.mrf.mxu0  ;;  %v2843_v63 = vpop.f32.mrf.mxu2  ;;  %v2750_v50 = vadd.f32 %v2737_v0, %v6232_v30 }
 0x2f7   : > { %v2864_v20 = vadd.f32 %v2843_v63, %v2745_v52 }
 0x2fb   : > { %v3040_v4 = vpop.f32.mrf.mxu3 }
 0x2fc   : > { %v3061_v56 = vadd.f32 %v3040_v4, %v2864_v20 }
 0x2fd   : > { %v2739_v21 = vpop.f32.mrf.mxu1 }
 0x2fe   : > { %v6250_v22 = vadd.f32 %v3237_v32, %v3061_v56  ;;  %v3240_v41 = vpop.f32.mrf.mxu0  ;;  %v2846_v40 = vpop.f32.mrf.mxu2  ;;  %v2751_v19 = vadd.f32 %v2739_v21, %v6236_v13 }
 0x2ff   : > { %v2865_v39 = vadd.f32 %v2846_v40, %v2746_v46 }
 0x303   : > { %v3043_v28 = vpop.f32.mrf.mxu3 }
 0x304   : > { %v3062_v7 = vadd.f32 %v3043_v28, %v2865_v39 }
 0x305   : > { %v3364_v43 = vpop.f32.mrf.mxu1 }
 0x306   : > { %v6253_v29 = vadd.f32 %v3240_v41, %v3062_v7  ;;  %v3242_v59 = vpop.f32.mrf.mxu0  ;;  %v2848_v54 = vpop.f32.mrf.mxu2  ;;  %v3386_v46 = vadd.f32 %v3364_v43, %v6247_v12 }
 0x307   : > { %v2866_v31 = vadd.f32 %v2848_v54, %v2747_v51 }
 0x30b   : > { %v3045_v9 = vpop.f32.mrf.mxu3 }
 0x30c   : > { %v3063_v53 = vadd.f32 %v3045_v9, %v2866_v31 }
 0x30d   : > { %v3366_v20 = vpop.f32.mrf.mxu1 }
 0x30e   : > { %v6256_v38 = vadd.f32 %v3242_v59, %v3063_v53  ;;  %v3245_v26 = vpop.f32.mrf.mxu0  ;;  %v2851_v45 = vpop.f32.mrf.mxu2 }
 0x30f   : > { %v2867_v61 = vadd.f32 %v2851_v45, %v2748_v55 }
 0x313   : > { %v3048_v57 = vpop.f32.mrf.mxu3 }
 0x314   : > { %v3064_v62 = vadd.f32 %v3048_v57, %v2867_v61 }
 0x315   : > { %v3369_v28 = vpop.f32.mrf.mxu1 }
 0x316   : > { %v6259_v16 = vadd.f32 %v3245_v26, %v3064_v62  ;;  %v3247_v42 = vpop.f32.mrf.mxu0  ;;  %v2853_v17 = vpop.f32.mrf.mxu2  ;;  %v3388_v12 = vadd.f32 %v3369_v28, %v6253_v29 }
 0x317   : > { %v2868_v60 = vadd.f32 %v2853_v17, %v2749_v49 }
 0x31b   : > { %v3050_v2 = vpop.f32.mrf.mxu3 }
 0x31c   : > { %v3065_v33 = vadd.f32 %v3050_v2, %v2868_v60 }
 0x31d   : > { %v3371_v31 = vpop.f32.mrf.mxu1 }
 0x31e   : > { %v6262_v6 = vadd.f32 %v3247_v42, %v3065_v33  ;;  %v3250_v37 = vpop.f32.mrf.mxu0  ;;  %v2856_v44 = vpop.f32.mrf.mxu2  ;;  %v3389_v8 = vadd.f32 %v3371_v31, %v6256_v38 }
 0x31f   : > { %v2869_v35 = vadd.f32 %v2856_v44, %v2750_v50 }
 0x323   : > { %v3053_v14 = vpop.f32.mrf.mxu3 }
 0x324   : > { %v3066_v1 = vadd.f32 %v3053_v14, %v2869_v35 }
 0x326   : > { %v6265_v3 = vadd.f32 %v3250_v37, %v3066_v1  ;;  %v3252_v11 = vpop.f32.mrf.mxu0  ;;  %v2858_v58 = vpop.f32.mrf.mxu2 }
 0x327   : > { %v2870_v24 = vadd.f32 %v2858_v58, %v2751_v19 }
 0x32b   : > { %v3055_v15 = vpop.f32.mrf.mxu3 }
 0x32c   : > { %v3067_v10 = vadd.f32 %v3055_v15, %v2870_v24 }
 0x32e   : > { %v6267_v47 = vadd.f32 %v3252_v11, %v3067_v10  ;;  %v3359_v30 = vpop.f32.mrf.mxu0  ;;  %v3510_v48 = vpop.f32.mrf.mxu2 }
 0x32f   : > { %v3384_v25 = vadd.f32 %v3359_v30, %v6239_v27 }
 0x331   : > { %v3535_v13 = vadd.f32 %v3510_v48, %v3384_v25 }
 0x333   : > { %v3549_v23 = vadd.f32 %v6273_v36, %v3535_v13 }
 0x335   : > { %v3559_v52 = vmax.f32 %v3549_v23, 0.0 }
 0x336   : > { %v3361_v27 = vpop.f32.mrf.mxu0  ;;  %v3512_v63 = vpop.f32.mrf.mxu2 }
 0x337   : > { %3569 = vst [vmem:[%s6280_s14] sm:$0xff] %v3559_v52  ;;  %v3385_v32 = vadd.f32 %v3361_v27, %v6244_v18  ;;  %v3387_v18 = vadd.f32 %v3366_v20, %v6250_v22  ;;  %v3374_v22 = vpop.f32.mrf.mxu1 }
 0x338   : > { %v3390_v49 = vadd.f32 %v3374_v22, %v6259_v16 }
 0x339   : > { %v3536_v5 = vadd.f32 %v3512_v63, %v3385_v32 }
 0x33b   : > { %v3550_v4 = vadd.f32 %v6273_v36, %v3536_v5 }
 0x33d   : > { %v3560_v56 = vmax.f32 %v3550_v4, 0.0 }
 0x33e   : > { %v3515_v41 = vpop.f32.mrf.mxu2 }
 0x33f   : > { %3570 = vst [vmem:[%s6280_s14 + $0x8] sm:$0xff] %v3560_v56  ;;  %v3537_v40 = vadd.f32 %v3515_v41, %v3386_v46  ;;  %v3376_v17 = vpop.f32.mrf.mxu1 }
 0x340   : > { %v3391_v38 = vadd.f32 %v3376_v17, %v6262_v6 }
 0x341   : > { %v3551_v39 = vadd.f32 %v6273_v36, %v3537_v40 }
 0x343   : > { %v3561_v7 = vmax.f32 %v3551_v39, 0.0 }
 0x345   : > { %3571 = vst [vmem:[%s6280_s14 + $0x10] sm:$0xff] %v3561_v7 }
 0x346   : > { %v3517_v34 = vpop.f32.mrf.mxu2 }
 0x347   : > { %v3538_v51 = vadd.f32 %v3517_v34, %v3387_v18  ;;  %v3379_v37 = vpop.f32.mrf.mxu1 }
 0x348   : > { %v3392_v16 = vadd.f32 %v3379_v37, %v6265_v3 }
 0x349   : > { %v3552_v59 = vadd.f32 %v6273_v36, %v3538_v51 }
 0x34b   : > { %v3562_v54 = vmax.f32 %v3552_v59, 0.0 }
 0x34d   : > { %3572 = vst [vmem:[%s6280_s14 + $0x18] sm:$0xff] %v3562_v54 }
 0x34e   : > { %v3520_v9 = vpop.f32.mrf.mxu2 }
 0x34f   : > { %v3539_v53 = vadd.f32 %v3520_v9, %v3388_v12  ;;  %v3381_v19 = vpop.f32.mrf.mxu1 }
 0x350   : > { %v3393_v11 = vadd.f32 %v3381_v19, %v6267_v47 }
 0x351   : > { %v3553_v55 = vadd.f32 %v6273_v36, %v3539_v53 }
 0x353   : > { %v3563_v26 = vmax.f32 %v3553_v55, 0.0 }
 0x355   : > { %3573 = vst [vmem:[%s6280_s14 + $0x20] sm:$0xff] %v3563_v26 }
 0x356   : > { %v3522_v45 = vpop.f32.mrf.mxu2 }
 0x357   : > { %v3540_v61 = vadd.f32 %v3522_v45, %v3389_v8 }
 0x359   : > { %v3554_v57 = vadd.f32 %v6273_v36, %v3540_v61 }
 0x35b   : > { %v3564_v62 = vmax.f32 %v3554_v57, 0.0 }
 0x35d   : > { %3574 = vst [vmem:[%s6280_s14 + $0x28] sm:$0xff] %v3564_v62 }
 0x35e   : > { %v3525_v29 = vpop.f32.mrf.mxu2 }
 0x35f   : > { %v3541_v42 = vadd.f32 %v3525_v29, %v3390_v49 }
 0x361   : > { %v3555_v60 = vadd.f32 %v6273_v36, %v3541_v42 }
 0x363   : > { %v3565_v0 = vmax.f32 %v3555_v60, 0.0 }
 0x365   : > { %3575 = vst [vmem:[%s6280_s14 + $0x30] sm:$0xff] %v3565_v0 }
 0x366   : > { %v3527_v2 = vpop.f32.mrf.mxu2 }
 0x367   : > { %v3542_v33 = vadd.f32 %v3527_v2, %v3391_v38 }
 0x369   : > { %v3556_v50 = vadd.f32 %v6273_v36, %v3542_v33 }
 0x36b   : > { %v3566_v44 = vmax.f32 %v3556_v50, 0.0 }
 0x36d   : > { %3576 = vst [vmem:[%s6280_s14 + $0x38] sm:$0xff] %v3566_v44 }
 0x36e   : > { %v3530_v35 = vpop.f32.mrf.mxu2 }
 0x36f   : > { %v3543_v21 = vadd.f32 %v3530_v35, %v3392_v16 }
 0x371   : > { %v3557_v14 = vadd.f32 %v6273_v36, %v3543_v21 }
 0x373   : > { %v3567_v1 = vmax.f32 %v3557_v14, 0.0 }
 0x375   : > { %3577 = vst [vmem:[%s6280_s14 + $0x40] sm:$0xff] %v3567_v1 }
 0x376   : > { %v3532_v6 = vpop.f32.mrf.mxu2 }
 0x377   : > { %v3544_v58 = vadd.f32 %v3532_v6, %v3393_v11 }
 0x379   : > { %v3558_v24 = vadd.f32 %v6273_v36, %v3544_v58 }
 0x37b   : > { %v3568_v15 = vmax.f32 %v3558_v24, 0.0 }
 0x37d   : > { %3578 = vst [vmem:[%s6280_s14 + $0x48] sm:$0xff] %v3568_v15 }
 0x37e PF: > { %s18_s27 = sadd.s32 1, %s5056_s27  }
 0x37f   : > { %p15_p4 = scmp.ge.s32.totalorder %s18_s27, 4  }
 0x381   :  { %17 = sbr.rel (!%p15_p4) target bundleno = 1 (0x1), region = 98 }

</bundles_post_ra>
